<compile_context>
chip_gen: v6e
topology: v6e:2x2x1
jax: 0.10.0
libtpu: 0.0.40
codegen_flags: <defaults>
</compile_context>

<pallas_src>
import functools

import jax
import jax.numpy as jnp
from jax.experimental import pallas as pl
from jax.experimental.pallas import tpu as pltpu

LANE = 128
MXU_CIN_THRESHOLD = 16   # block conv goes to the MXU only above this Cin


def _round_up(n, m):
    return ((n + m - 1) // m) * m


def _pad2d(a, rows, cols, dtype=None):
    dt = a.dtype if dtype is None else dtype
    out = jnp.zeros((rows, cols), dt)
    return out.at[: a.shape[0], : a.shape[1]].set(a.astype(dt))


def _encoder_block_kernel(
    x_ref,                       # (1, Cin, T)  f32 (bf16 for wide Cin)
    wbt_ref, bb_ref,             # block 1x1 conv: (Cp, Cin), (Cp, 1)
    w1t_ref, b1_ref,             # spatial fc1:    (Rp, Cp) bf16, (Rp, 1) f32
    w2_ref, b2_ref,              # spatial fc2:    (Rp, 1) f32,   (1, 1) f32 in SMEM
    wc1t_ref, bc1_ref,           # channel fc1:    (Crp, Cp) f32, (Crp, 1) f32
    wc2t_ref, bc2_ref,           # channel fc2:    (Cp, Crp) f32, (Cp, 1) f32
    o_ref,                       # (1, C, T)     f32   (unpadded channels, NCHW layout)
    csum_ref,                    # VMEM (Cp, 1)  f32 : per-batch channel-sum accumulator
    g2_ref,                      # VMEM (Cp, 1)  f32 : finalized channel gate
    *, cin, out_c, inv_hw,
):
    p = pl.program_id(1)         # phase: 0 = channel-sum pass, 1 = gate + write pass
    t = pl.program_id(2)         # spatial tile
    last_t = pl.num_programs(2) - 1

    # --- block: 1x1 conv + ReLU, channel-major (Cp, T) ---
    # TODO(synk): for wide user blocks (Cin > 16), cache f in a bf16 VMEM scratch during
    # phase 0 instead of re-streaming x and recomputing the block conv in phase 1.
    x = x_ref[0]                                                    # (Cin, T)
    if cin > MXU_CIN_THRESHOLD:
        f = jnp.dot(wbt_ref[...].astype(jnp.bfloat16), x.astype(jnp.bfloat16),
                    preferred_element_type=jnp.float32)
    else:
        # Tiny K: unrolled VPU broadcast-FMA, keeps the MXU free for the spatial gate.
        wbt = wbt_ref[...]
        f = wbt[:, 0:1] * x[0:1, :].astype(jnp.float32)
        for c in range(1, cin):
            f = f + wbt[:, c:c + 1] * x[c:c + 1, :].astype(jnp.float32)
    f = jnp.maximum(f + bb_ref[...], 0.0)                           # (Cp, T) f32

    @pl.when(p == 0)
    def _accumulate_channel_sum():
        @pl.when(t == 0)
        def _reset():
            csum_ref[...] = jnp.zeros_like(csum_ref)

        csum_ref[...] += jnp.sum(f, axis=1, keepdims=True)          # lane reduce -> (Cp, 1)

        # Finalize the channel gate on the last phase-0 step so it overlaps the phase
        # transition instead of delaying the first phase-1 tile.
        @pl.when(t == last_t)
        def _finalize_channel_gate():
            m = csum_ref[...] * inv_hw                              # (Cp, 1) global avg pool
            mb = jnp.broadcast_to(m, (m.shape[0], LANE))            # full-lane matmuls, once/batch
            y = jnp.dot(wc1t_ref[...], mb, preferred_element_type=jnp.float32) + bc1_ref[...]
            y = jnp.maximum(y, 0.0)                                 # (Crp, LANE)
            g2 = jax.nn.sigmoid(
                jnp.dot(wc2t_ref[...], y, preferred_element_type=jnp.float32) + bc2_ref[...])
            g2_ref[...] = g2[:, 0:1]                                # (Cp, 1)

    @pl.when(p == 1)
    def _gate_and_write():
        # Spatial gate: conv1x1 (full-K MXU) -> relu -> 1-channel conv as VPU multiply +
        # sublane reduction -> sigmoid.
        h = jnp.dot(w1t_ref[...], f.astype(jnp.bfloat16),
                    preferred_element_type=jnp.float32) + b1_ref[...]
        h = jnp.maximum(h, 0.0)                                     # (Rp, T)
        s = jnp.sum(h * w2_ref[...], axis=0, keepdims=True) + b2_ref[0, 0]
        g1 = jax.nn.sigmoid(s)                                      # (1, T)

        # Fused gated combine f*g1 + f*g2 == f*(g1+g2); store only the real channels
        # (lane axis = spatial, so the store stays lane-dense and unmasked).
        o_ref[0] = (f * (g1 + g2_ref[...]))[:out_c, :]


def encoder_block_pallas(x_nchw, params, *, tile_hw=None):
    """x_nchw: (B, Cin, H, W) float32. Returns (B, C, H, W) float32."""
    B, Cin, H, W = x_nchw.shape
    HW = H * W
    (wb, bb, w1, b1, w2, b2, wc1, bc1, wc2, bc2) = params
    C = wb.shape[1]
    R = w1.shape[1]
    Cr = wc1.shape[1]

    # Lane-dense padding of channel-like dims (padded weight rows/cols are zero, so padded
    # channels of f / h / y stay exactly zero and are never stored).
    Cp = _round_up(C, LANE)
    Rp = _round_up(R, LANE)
    Crp = _round_up(Cr, LANE)

    # Spatial tile: as large as comfortably fits VMEM (per-step overhead ~0.35us), and
    # lane-aligned so output stores are unmasked.
    if tile_hw is None:
        tile_hw = HW
        for cand in (2048, 1024, 512, 256, 128):
            if HW % cand == 0:
                tile_hw = cand
                break
    assert HW % tile_hw == 0, (HW, tile_hw)
    assert tile_hw == HW or tile_hw % LANE == 0, tile_hw
    num_t = HW // tile_hw

    # Input stays NCHW; flattening spatial is a free reshape (no HBM pass).  Stream f32 for
    # tiny Cin (VPU block-conv path); bf16 only when the block conv is wide enough for MXU.
    x_dt = jnp.bfloat16 if Cin > MXU_CIN_THRESHOLD else jnp.float32
    x = x_nchw.reshape(B, Cin, HW).astype(x_dt)

    # Channel-major (column-form) weights.
    col = lambda v, rows: _pad2d(v.reshape(-1, 1), rows, 1)
    wbt = _pad2d(wb.T, Cp, Cin)                       # (Cp, Cin) f32
    bbc = col(bb, Cp)
    w1t = _pad2d(w1.T, Rp, Cp, jnp.bfloat16)          # (Rp, Cp) bf16 (hot-path MXU weight)
    b1c = col(b1, Rp)
    w2c = _pad2d(w2, Rp, 1)                           # (R, 1) conv weight -> column
    b2s = b2.reshape(1, 1).astype(jnp.float32)        # scalar bias -> SMEM
    wc1t = _pad2d(wc1.T, Crp, Cp)
    bc1c = col(bc1, Crp)
    wc2t = _pad2d(wc2.T, Cp, Crp)
    bc2c = col(bc2, Cp)

    full = lambda shape: pl.BlockSpec(shape, lambda b, p, t: (0, 0))

    # Explicit VMEM budget: double-buffered x/out blocks + f/h/gated temporaries + weights.
    # Floor 32 MiB (fits every chip), cap 56 MiB (stays under v7x's 64 MiB physical VMEM).
    vmem_need = (2 * tile_hw * Cin * x.dtype.itemsize
                 + 2 * tile_hw * C * 4
                 + 8 * tile_hw * Cp * 4
                 + (2 << 20))
    vmem_limit = int(min(max(vmem_need, 32 << 20), 56 << 20))

    out = pl.pallas_call(
        functools.partial(_encoder_block_kernel, cin=Cin, out_c=C, inv_hw=1.0 / HW),
        out_shape=jax.ShapeDtypeStruct((B, C, HW), jnp.float32),
        grid_spec=pltpu.PrefetchScalarGridSpec(
            num_scalar_prefetch=0,
            # (batch, phase, spatial tile)
            # TODO(synk): on v7x with B == 1, add a second parallel axis (split HW into
            # per-core super-tiles with partial channel sums) so both TensorCores are fed.
            grid=(B, 2, num_t),
            in_specs=[
                pl.BlockSpec((1, Cin, tile_hw), lambda b, p, t: (b, 0, t)),
                full((Cp, Cin)), full((Cp, 1)),
                full((Rp, Cp)), full((Rp, 1)),
                full((Rp, 1)),
                pl.BlockSpec(memory_space=pltpu.MemorySpace.SMEM),   # b2 scalar bias
                full((Crp, Cp)), full((Crp, 1)),
                full((Cp, Crp)), full((Cp, 1)),
            ],
            # t*p: every phase-0 step aliases the batch's first output block; that block is
            # never written during phase 0 and is fully overwritten by phase-1 t=0 before its
            # block index changes, so HBM sees exactly one write per output tile.
            out_specs=pl.BlockSpec((1, C, tile_hw), lambda b, p, t: (b, 0, t * p)),
            scratch_shapes=[
                pltpu.VMEM((Cp, 1), jnp.float32),   # channel-sum accumulator
                pltpu.VMEM((Cp, 1), jnp.float32),   # finalized channel gate
            ],
        ),
        compiler_params=pltpu.CompilerParams(
            dimension_semantics=("parallel", "arbitrary", "arbitrary"),
            vmem_limit_bytes=vmem_limit,
        ),
    )(x, wbt, bbc, w1t, b1c, w2c, b2s, wc1t, bc1c, wc2t, bc2c)

    # Free reshape back to (B, C, H, W) — no transpose / slice HBM passes.
    return out.reshape(B, C, H, W)


def _reference(x_nchw, params):
    """Pure-JAX reference mirroring the kernel's numerics (f32 block conv, bf16 spatial fc1)."""
    (wb, bb, w1, b1, w2, b2, wc1, bc1, wc2, bc2) = params
    B, Cin, H, W = x_nchw.shape
    C = wb.shape[1]
    x = jnp.transpose(x_nchw, (0, 2, 3, 1)).reshape(B, H * W, Cin)
    r16 = lambda a: a.astype(jnp.bfloat16).astype(jnp.float32)
    f = jnp.maximum(x @ wb + bb, 0.0)                              # block (1x1 conv + relu)
    h = jnp.maximum(r16(f) @ r16(w1) + b1, 0.0)                    # spatial gate fc1
    g1 = jax.nn.sigmoid(h @ w2 + b2)                               # (B, HW, 1)
    m = jnp.mean(f, axis=1, keepdims=True)                         # (B, 1, C) global avg pool
    y = jnp.maximum(m @ wc1 + bc1, 0.0)
    g2 = jax.nn.sigmoid(y @ wc2 + bc2)                             # (B, 1, C)
    out = f * g1 + f * g2
    return jnp.transpose(out.reshape(B, H, W, C), (0, 3, 1, 2))


def make_params(key, cin, c, reduction=16):
    """Deterministic parameter init mirroring the PyTorch module's shapes.
    Weights are stored as (in, out); the wrapper transposes them to channel-major form."""
    ks = jax.random.split(key, 10)
    r = reduction          # SpatialAttentionGate hidden channels
    cr = c // reduction    # ChannelAttentionGate hidden width

    def init(k, shape, fan_in):
        return (jax.random.normal(k, shape, jnp.float32) / jnp.sqrt(fan_in)).astype(jnp.float32)

    wb = init(ks[0], (cin, c), cin)
    bb = init(ks[1], (1, c), cin)
    w1 = init(ks[2], (c, r), c)        # Conv2d(c, r, 1)
    b1 = init(ks[3], (1, r), c)
    w2 = init(ks[4], (r, 1), r)        # Conv2d(r, 1, 1)
    b2 = init(ks[5], (1, 1), r)
    wc1 = init(ks[6], (c, cr), c)      # Linear(c, c // reduction)
    bc1 = init(ks[7], (1, cr), c)
    wc2 = init(ks[8], (cr, c), cr)     # Linear(c // reduction, c)
    bc2 = init(ks[9], (1, c), cr)
    return (wb, bb, w1, b1, w2, b2, wc1, bc1, wc2, bc2)


if __name__ == "__main__":
    key = jax.random.PRNGKey(0)
    k_x, k_p = jax.random.split(key)

    B, Cin, H, W = 2, 4, 16, 16
    OUT_CHANNELS = 32          # must be divisible by reduction=16

    x = jax.random.normal(k_x, (B, Cin, H, W), jnp.float32)
    params = make_params(k_p, Cin, OUT_CHANNELS, reduction=16)

    # tile_hw=128 -> 2 spatial tiles per batch, exercising the two-phase channel-mean
    # accumulation and the per-tile pipeline while staying lane-aligned.
    out = jax.block_until_ready(encoder_block_pallas(x, params, tile_hw=128))
    ref = jax.block_until_ready(_reference(x, params))

    assert out.shape == (B, OUT_CHANNELS, H, W), out.shape
    err = float(jnp.max(jnp.abs(out - ref)))
    assert err < 2e-2, err
    print("KERNEL_OK")
</pallas_src>

<mosaic_0001>
module attributes {stable_mosaic.version = 11 : i64} {
  func.func @_encoder_block_kernel(%arg0: i32, %arg1: i32, %arg2: i32, %arg3: memref<1x4x128xf32, #tpu.memory_space<vmem>>, %arg4: memref<128x4xf32, #tpu.memory_space<vmem>>, %arg5: memref<128x1xf32, #tpu.memory_space<vmem>>, %arg6: memref<128x128xbf16, #tpu.memory_space<vmem>>, %arg7: memref<128x1xf32, #tpu.memory_space<vmem>>, %arg8: memref<128x1xf32, #tpu.memory_space<vmem>>, %arg9: memref<1x1xf32, #tpu.memory_space<smem>>, %arg10: memref<128x128xf32, #tpu.memory_space<vmem>>, %arg11: memref<128x1xf32, #tpu.memory_space<vmem>>, %arg12: memref<128x128xf32, #tpu.memory_space<vmem>>, %arg13: memref<128x1xf32, #tpu.memory_space<vmem>>, %arg14: memref<1x32x128xf32, #tpu.memory_space<vmem>>, %arg15: memref<128x1xf32, #tpu.memory_space<vmem>>, %arg16: memref<128x1xf32, #tpu.memory_space<vmem>>) attributes {dimension_semantics = [#tpu.dimension_semantics<parallel>, #tpu.dimension_semantics<arbitrary>, #tpu.dimension_semantics<arbitrary>], iteration_bounds = array<i64: 2, 2, 2>, scalar_prefetch = 0 : i64, scratch_operands = 2 : i64, tpu.core_type = #tpu.core_type<tc>, window_params = [{transform_indices = @transform_0, window_bounds = array<i64: 1, 4, 128>}, {pipeline_mode = #tpu.pipeline_mode<synchronous>, transform_indices = @transform_1, window_bounds = array<i64: 128, 4>}, {pipeline_mode = #tpu.pipeline_mode<synchronous>, transform_indices = @transform_2, window_bounds = array<i64: 128, 1>}, {pipeline_mode = #tpu.pipeline_mode<synchronous>, transform_indices = @transform_3, window_bounds = array<i64: 128, 128>}, {pipeline_mode = #tpu.pipeline_mode<synchronous>, transform_indices = @transform_4, window_bounds = array<i64: 128, 1>}, {pipeline_mode = #tpu.pipeline_mode<synchronous>, transform_indices = @transform_5, window_bounds = array<i64: 128, 1>}, {transform_indices = @transform_6, window_bounds = array<i64: 1, 1>}, {pipeline_mode = #tpu.pipeline_mode<synchronous>, transform_indices = @transform_7, window_bounds = array<i64: 128, 128>}, {pipeline_mode = #tpu.pipeline_mode<synchronous>, transform_indices = @transform_8, window_bounds = array<i64: 128, 1>}, {pipeline_mode = #tpu.pipeline_mode<synchronous>, transform_indices = @transform_9, window_bounds = array<i64: 128, 128>}, {pipeline_mode = #tpu.pipeline_mode<synchronous>, transform_indices = @transform_10, window_bounds = array<i64: 128, 1>}, {transform_indices = @transform_11, window_bounds = array<i64: 1, 32, 128>}]} {
    %c0 = arith.constant 0 : index
    %c0_0 = arith.constant 0 : index
    %c0_1 = arith.constant 0 : index
    %0 = vector.load %arg3[%c0, %c0_0, %c0_1] : memref<1x4x128xf32, #tpu.memory_space<vmem>>, vector<1x4x128xf32>
    %1 = vector.shape_cast %0 : vector<1x4x128xf32> to vector<4x128xf32>
    %c0_2 = arith.constant 0 : index
    %c0_3 = arith.constant 0 : index
    %2 = vector.load %arg4[%c0_2, %c0_3] : memref<128x4xf32, #tpu.memory_space<vmem>>, vector<128x4xf32>
    %3 = vector.extract_strided_slice %2 {offsets = [0, 0], sizes = [128, 1], strides = [1, 1]} : vector<128x4xf32> to vector<128x1xf32>
    %4 = vector.extract_strided_slice %1 {offsets = [0, 0], sizes = [1, 128], strides = [1, 1]} : vector<4x128xf32> to vector<1x128xf32>
    %5 = vector.broadcast %3 : vector<128x1xf32> to vector<128x128xf32>
    %6 = vector.broadcast %4 : vector<1x128xf32> to vector<128x128xf32>
    %7 = arith.mulf %5, %6 : vector<128x128xf32>
    %8 = vector.extract_strided_slice %2 {offsets = [0, 1], sizes = [128, 1], strides = [1, 1]} : vector<128x4xf32> to vector<128x1xf32>
    %9 = vector.extract_strided_slice %1 {offsets = [1, 0], sizes = [1, 128], strides = [1, 1]} : vector<4x128xf32> to vector<1x128xf32>
    %10 = vector.broadcast %8 : vector<128x1xf32> to vector<128x128xf32>
    %11 = vector.broadcast %9 : vector<1x128xf32> to vector<128x128xf32>
    %12 = arith.mulf %10, %11 : vector<128x128xf32>
    %13 = arith.addf %7, %12 : vector<128x128xf32>
    %14 = vector.extract_strided_slice %2 {offsets = [0, 2], sizes = [128, 1], strides = [1, 1]} : vector<128x4xf32> to vector<128x1xf32>
    %15 = vector.extract_strided_slice %1 {offsets = [2, 0], sizes = [1, 128], strides = [1, 1]} : vector<4x128xf32> to vector<1x128xf32>
    %16 = vector.broadcast %14 : vector<128x1xf32> to vector<128x128xf32>
    %17 = vector.broadcast %15 : vector<1x128xf32> to vector<128x128xf32>
    %18 = arith.mulf %16, %17 : vector<128x128xf32>
    %19 = arith.addf %13, %18 : vector<128x128xf32>
    %20 = vector.extract_strided_slice %2 {offsets = [0, 3], sizes = [128, 1], strides = [1, 1]} : vector<128x4xf32> to vector<128x1xf32>
    %21 = vector.extract_strided_slice %1 {offsets = [3, 0], sizes = [1, 128], strides = [1, 1]} : vector<4x128xf32> to vector<1x128xf32>
    %22 = vector.broadcast %20 : vector<128x1xf32> to vector<128x128xf32>
    %23 = vector.broadcast %21 : vector<1x128xf32> to vector<128x128xf32>
    %24 = arith.mulf %22, %23 : vector<128x128xf32>
    %25 = arith.addf %19, %24 : vector<128x128xf32>
    %c0_4 = arith.constant 0 : index
    %c0_5 = arith.constant 0 : index
    %26 = vector.load %arg5[%c0_4, %c0_5] : memref<128x1xf32, #tpu.memory_space<vmem>>, vector<128x1xf32>
    %27 = vector.broadcast %26 : vector<128x1xf32> to vector<128x128xf32>
    %28 = arith.addf %25, %27 : vector<128x128xf32>
    %cst = arith.constant 0.000000e+00 : f32
    %29 = vector.broadcast %cst : f32 to vector<128x128xf32>
    %30 = arith.maximumf %28, %29 : vector<128x128xf32>
    %c0_i32 = arith.constant 0 : i32
    %31 = arith.cmpi eq, %arg1, %c0_i32 : i32
    %32 = arith.extui %31 : i1 to i32
    %c0_i32_6 = arith.constant 0 : i32
    %33 = arith.cmpi ne, %32, %c0_i32_6 : i32
    scf.if %33 {
      %c0_i32_8 = arith.constant 0 : i32
      %37 = arith.cmpi eq, %arg2, %c0_i32_8 : i32
      %38 = arith.extui %37 : i1 to i32
      %c0_i32_9 = arith.constant 0 : i32
      %39 = arith.cmpi ne, %38, %c0_i32_9 : i32
      scf.if %39 {
        %cst_17 = arith.constant 0.000000e+00 : f32
        %48 = vector.broadcast %cst_17 : f32 to vector<128x1xf32>
        %c0_18 = arith.constant 0 : index
        %c0_19 = arith.constant 0 : index
        %49 = vector.load %arg15[%c0_18, %c0_19] : memref<128x1xf32, #tpu.memory_space<vmem>>, vector<128x1xf32>
        tpu.vector_store %arg15[%c0_18, %c0_19], %48 {strides = array<i32>} : memref<128x1xf32, #tpu.memory_space<vmem>>, vector<128x1xf32>,
      } else {
      }
      %c0_10 = arith.constant 0 : index
      %c0_11 = arith.constant 0 : index
      %40 = vector.load %arg15[%c0_10, %c0_11] : memref<128x1xf32, #tpu.memory_space<vmem>>, vector<128x1xf32>
      %cst_12 = arith.constant dense<0.000000e+00> : vector<128xf32>
      %41 = vector.multi_reduction <add>, %30, %cst_12 [1] : vector<128x128xf32> to vector<128xf32>
      %42 = vector.shape_cast %41 : vector<128xf32> to vector<128x1xf32>
      %43 = arith.addf %40, %42 : vector<128x1xf32>
      %c0_13 = arith.constant 0 : index
      %c0_14 = arith.constant 0 : index
      %44 = vector.load %arg15[%c0_13, %c0_14] : memref<128x1xf32, #tpu.memory_space<vmem>>, vector<128x1xf32>
      tpu.vector_store %arg15[%c0_13, %c0_14], %43 {strides = array<i32>} : memref<128x1xf32, #tpu.memory_space<vmem>>, vector<128x1xf32>,
      %c1_i32_15 = arith.constant 1 : i32
      %45 = arith.cmpi eq, %arg2, %c1_i32_15 : i32
      %46 = arith.extui %45 : i1 to i32
      %c0_i32_16 = arith.constant 0 : i32
      %47 = arith.cmpi ne, %46, %c0_i32_16 : i32
      scf.if %47 {
        %c0_17 = arith.constant 0 : index
        %c0_18 = arith.constant 0 : index
        %48 = vector.load %arg15[%c0_17, %c0_18] : memref<128x1xf32, #tpu.memory_space<vmem>>, vector<128x1xf32>
        %cst_19 = arith.constant 3.906250e-03 : f32
        %49 = vector.broadcast %cst_19 : f32 to vector<128x1xf32>
        %50 = arith.mulf %48, %49 : vector<128x1xf32>
        %51 = vector.shape_cast %50 : vector<128x1xf32> to vector<128x1xf32>
        %52 = vector.broadcast %51 : vector<128x1xf32> to vector<128x128xf32>
        %c0_20 = arith.constant 0 : index
        %c0_21 = arith.constant 0 : index
        %53 = vector.load %arg10[%c0_20, %c0_21] : memref<128x128xf32, #tpu.memory_space<vmem>>, vector<128x128xf32>
        %cst_22 = arith.constant dense<0.000000e+00> : vector<128x128xf32>
        %54 = tpu.matmul %53, %52, %cst_22 {dimension_numbers = #tpu.dot_dimension_numbers<[1], [0], [0], [1], [0, 0, 1, 1], [], []>} : vector<128x128xf32>, vector<128x128xf32>, vector<128x128xf32> -> vector<128x128xf32>
        %c0_23 = arith.constant 0 : index
        %c0_24 = arith.constant 0 : index
        %55 = vector.load %arg11[%c0_23, %c0_24] : memref<128x1xf32, #tpu.memory_space<vmem>>, vector<128x1xf32>
        %56 = vector.broadcast %55 : vector<128x1xf32> to vector<128x128xf32>
        %57 = arith.addf %54, %56 : vector<128x128xf32>
        %cst_25 = arith.constant 0.000000e+00 : f32
        %58 = vector.broadcast %cst_25 : f32 to vector<128x128xf32>
        %59 = arith.maximumf %57, %58 : vector<128x128xf32>
        %c0_26 = arith.constant 0 : index
        %c0_27 = arith.constant 0 : index
        %60 = vector.load %arg12[%c0_26, %c0_27] : memref<128x128xf32, #tpu.memory_space<vmem>>, vector<128x128xf32>
        %cst_28 = arith.constant dense<0.000000e+00> : vector<128x128xf32>
        %61 = tpu.matmul %60, %59, %cst_28 {dimension_numbers = #tpu.dot_dimension_numbers<[1], [0], [0], [1], [0, 0, 1, 1], [], []>} : vector<128x128xf32>, vector<128x128xf32>, vector<128x128xf32> -> vector<128x128xf32>
        %c0_29 = arith.constant 0 : index
        %c0_30 = arith.constant 0 : index
        %62 = vector.load %arg13[%c0_29, %c0_30] : memref<128x1xf32, #tpu.memory_space<vmem>>, vector<128x1xf32>
        %63 = vector.broadcast %62 : vector<128x1xf32> to vector<128x128xf32>
        %64 = arith.addf %61, %63 : vector<128x128xf32>
        %65 = arith.negf %64 : vector<128x128xf32>
        %66 = math.exp %65 : vector<128x128xf32>
        %cst_31 = arith.constant 1.000000e+00 : f32
        %67 = vector.broadcast %cst_31 : f32 to vector<128x128xf32>
        %68 = arith.addf %67, %66 : vector<128x128xf32>
        %69 = arith.divf %67, %68 : vector<128x128xf32>
        %70 = vector.extract_strided_slice %69 {offsets = [0, 0], sizes = [128, 1], strides = [1, 1]} : vector<128x128xf32> to vector<128x1xf32>
        %c0_32 = arith.constant 0 : index
        %c0_33 = arith.constant 0 : index
        %71 = vector.load %arg16[%c0_32, %c0_33] : memref<128x1xf32, #tpu.memory_space<vmem>>, vector<128x1xf32>
        tpu.vector_store %arg16[%c0_32, %c0_33], %70 {strides = array<i32>} : memref<128x1xf32, #tpu.memory_space<vmem>>, vector<128x1xf32>,
      } else {
      }
    } else {
    }
    %c1_i32 = arith.constant 1 : i32
    %34 = arith.cmpi eq, %arg1, %c1_i32 : i32
    %35 = arith.extui %34 : i1 to i32
    %c0_i32_7 = arith.constant 0 : i32
    %36 = arith.cmpi ne, %35, %c0_i32_7 : i32
    scf.if %36 {
      %c0_8 = arith.constant 0 : index
      %c0_9 = arith.constant 0 : index
      %37 = vector.load %arg6[%c0_8, %c0_9] : memref<128x128xbf16, #tpu.memory_space<vmem>>, vector<128x128xbf16>
      %38 = arith.truncf %30 : vector<128x128xf32> to vector<128x128xbf16>
      %cst_10 = arith.constant dense<0.000000e+00> : vector<128x128xf32>
      %39 = tpu.matmul %37, %38, %cst_10 {dimension_numbers = #tpu.dot_dimension_numbers<[1], [0], [0], [1], [0, 0, 1, 1], [], []>} : vector<128x128xbf16>, vector<128x128xbf16>, vector<128x128xf32> -> vector<128x128xf32>
      %c0_11 = arith.constant 0 : index
      %c0_12 = arith.constant 0 : index
      %40 = vector.load %arg7[%c0_11, %c0_12] : memref<128x1xf32, #tpu.memory_space<vmem>>, vector<128x1xf32>
      %41 = vector.broadcast %40 : vector<128x1xf32> to vector<128x128xf32>
      %42 = arith.addf %39, %41 : vector<128x128xf32>
      %cst_13 = arith.constant 0.000000e+00 : f32
      %43 = vector.broadcast %cst_13 : f32 to vector<128x128xf32>
      %44 = arith.maximumf %42, %43 : vector<128x128xf32>
      %c0_14 = arith.constant 0 : index
      %c0_15 = arith.constant 0 : index
      %45 = vector.load %arg8[%c0_14, %c0_15] : memref<128x1xf32, #tpu.memory_space<vmem>>, vector<128x1xf32>
      %46 = vector.broadcast %45 : vector<128x1xf32> to vector<128x128xf32>
      %47 = arith.mulf %44, %46 : vector<128x128xf32>
      %cst_16 = arith.constant dense<0.000000e+00> : vector<128xf32>
      %48 = vector.multi_reduction <add>, %47, %cst_16 [0] : vector<128x128xf32> to vector<128xf32>
      %49 = vector.shape_cast %48 : vector<128xf32> to vector<1x128xf32>
      %c0_17 = arith.constant 0 : index
      %c0_18 = arith.constant 0 : index
      %50 = memref.load %arg9[%c0_17, %c0_18] : memref<1x1xf32, #tpu.memory_space<smem>>
      %51 = vector.broadcast %50 : f32 to vector<1x128xf32>
      %52 = arith.addf %49, %51 : vector<1x128xf32>
      %53 = arith.negf %52 : vector<1x128xf32>
      %54 = math.exp %53 : vector<1x128xf32>
      %cst_19 = arith.constant 1.000000e+00 : f32
      %55 = vector.broadcast %cst_19 : f32 to vector<1x128xf32>
      %56 = arith.addf %55, %54 : vector<1x128xf32>
      %57 = arith.divf %55, %56 : vector<1x128xf32>
      %c0_20 = arith.constant 0 : index
      %c0_21 = arith.constant 0 : index
      %58 = vector.load %arg16[%c0_20, %c0_21] : memref<128x1xf32, #tpu.memory_space<vmem>>, vector<128x1xf32>
      %59 = vector.broadcast %57 : vector<1x128xf32> to vector<128x128xf32>
      %60 = vector.broadcast %58 : vector<128x1xf32> to vector<128x128xf32>
      %61 = arith.addf %59, %60 : vector<128x128xf32>
      %62 = arith.mulf %30, %61 : vector<128x128xf32>
      %63 = vector.extract_strided_slice %62 {offsets = [0, 0], sizes = [32, 128], strides = [1, 1]} : vector<128x128xf32> to vector<32x128xf32>
      %c0_22 = arith.constant 0 : index
      %c0_23 = arith.constant 0 : index
      %c0_24 = arith.constant 0 : index
      %64 = vector.load %arg14[%c0_22, %c0_23, %c0_24] : memref<1x32x128xf32, #tpu.memory_space<vmem>>, vector<1x32x128xf32>
      %65 = vector.shape_cast %64 : vector<1x32x128xf32> to vector<32x128xf32>
      %66 = vector.shape_cast %63 : vector<32x128xf32> to vector<1x32x128xf32>
      tpu.vector_store %arg14[%c0_22, %c0_23, %c0_24], %66 {strides = array<i32>} : memref<1x32x128xf32, #tpu.memory_space<vmem>>, vector<1x32x128xf32>,
    } else {
    }
    return
  }
  func.func @transform_0(%arg0: i32, %arg1: i32, %arg2: i32) -> (i32, i32, i32) {
    %c0_i32 = arith.constant 0 : i32
    %c0_i32_0 = arith.constant 0 : i32
    return %arg0, %c0_i32, %arg2 : i32, i32, i32
  }
  func.func @transform_1(%arg0: i32, %arg1: i32, %arg2: i32) -> (i32, i32) {
    %c0_i32 = arith.constant 0 : i32
    %c0_i32_0 = arith.constant 0 : i32
    %c0_i32_1 = arith.constant 0 : i32
    return %c0_i32, %c0_i32_0 : i32, i32
  }
  func.func @transform_2(%arg0: i32, %arg1: i32, %arg2: i32) -> (i32, i32) {
    %c0_i32 = arith.constant 0 : i32
    %c0_i32_0 = arith.constant 0 : i32
    %c0_i32_1 = arith.constant 0 : i32
    return %c0_i32, %c0_i32_0 : i32, i32
  }
  func.func @transform_3(%arg0: i32, %arg1: i32, %arg2: i32) -> (i32, i32) {
    %c0_i32 = arith.constant 0 : i32
    %c0_i32_0 = arith.constant 0 : i32
    %c0_i32_1 = arith.constant 0 : i32
    return %c0_i32, %c0_i32_0 : i32, i32
  }
  func.func @transform_4(%arg0: i32, %arg1: i32, %arg2: i32) -> (i32, i32) {
    %c0_i32 = arith.constant 0 : i32
    %c0_i32_0 = arith.constant 0 : i32
    %c0_i32_1 = arith.constant 0 : i32
    return %c0_i32, %c0_i32_0 : i32, i32
  }
  func.func @transform_5(%arg0: i32, %arg1: i32, %arg2: i32) -> (i32, i32) {
    %c0_i32 = arith.constant 0 : i32
    %c0_i32_0 = arith.constant 0 : i32
    %c0_i32_1 = arith.constant 0 : i32
    return %c0_i32, %c0_i32_0 : i32, i32
  }
  func.func @transform_6(%arg0: i32, %arg1: i32, %arg2: i32) -> (i32, i32) {
    %c0_i32 = arith.constant 0 : i32
    %c0_i32_0 = arith.constant 0 : i32
    %c0_i32_1 = arith.constant 0 : i32
    return %c0_i32, %c0_i32_0 : i32, i32
  }
  func.func @transform_7(%arg0: i32, %arg1: i32, %arg2: i32) -> (i32, i32) {
    %c0_i32 = arith.constant 0 : i32
    %c0_i32_0 = arith.constant 0 : i32
    %c0_i32_1 = arith.constant 0 : i32
    return %c0_i32, %c0_i32_0 : i32, i32
  }
  func.func @transform_8(%arg0: i32, %arg1: i32, %arg2: i32) -> (i32, i32) {
    %c0_i32 = arith.constant 0 : i32
    %c0_i32_0 = arith.constant 0 : i32
    %c0_i32_1 = arith.constant 0 : i32
    return %c0_i32, %c0_i32_0 : i32, i32
  }
  func.func @transform_9(%arg0: i32, %arg1: i32, %arg2: i32) -> (i32, i32) {
    %c0_i32 = arith.constant 0 : i32
    %c0_i32_0 = arith.constant 0 : i32
    %c0_i32_1 = arith.constant 0 : i32
    return %c0_i32, %c0_i32_0 : i32, i32
  }
  func.func @transform_10(%arg0: i32, %arg1: i32, %arg2: i32) -> (i32, i32) {
    %c0_i32 = arith.constant 0 : i32
    %c0_i32_0 = arith.constant 0 : i32
    %c0_i32_1 = arith.constant 0 : i32
    return %c0_i32, %c0_i32_0 : i32, i32
  }
  func.func @transform_11(%arg0: i32, %arg1: i32, %arg2: i32) -> (i32, i32, i32) {
    %0 = arith.muli %arg2, %arg1 : i32
    %c0_i32 = arith.constant 0 : i32
    %c0_i32_0 = arith.constant 0 : i32
    return %arg0, %c0_i32, %0 : i32, i32, i32
  }
}

</mosaic_0001>

<bundles_post_ra>
// kernel: tpu_custom_call.1
= control target key start
LH: loop header
LB: loop body
LE: loop exit
PB: predicated region body
PF: predicated region fallthrough
CT: control target
= control target key end

     0   :  { %s3996_s0 = inlined_call_operand.vmem [shape: f32[2,4,256], index: 0, kind: input, shape index: {}]   ;;  %s3997_s1 = inlined_call_operand.vmem [shape: f32[128,4], index: 1, kind: input, shape index: {}]   ;;  %s3998_s2 = inlined_call_operand.vmem [shape: f32[128,1], index: 2, kind: input, shape index: {}]   ;;  %s3999_s3 = inlined_call_operand.vmem [shape: bf16[128,128], index: 3, kind: input, shape index: {}]   ;;  %s4000_s4 = inlined_call_operand.vmem [shape: f32[128,1], index: 4, kind: input, shape index: {}]   ;;  %s4001_s5 = inlined_call_operand.vmem [shape: f32[128,1], index: 5, kind: input, shape index: {}]   ;;  %s4002_s6 = inlined_call_operand.<no memory space> [shape: f32[1,1], index: 6, kind: input, shape index: {}]   ;;  %s4003_s7 = inlined_call_operand.vmem [shape: f32[128,128], index: 7, kind: input, shape index: {}]   ;;  %s4004_s8 = inlined_call_operand.vmem [shape: f32[128,1], index: 8, kind: input, shape index: {}]   ;;  %s4005_s9 = inlined_call_operand.vmem [shape: f32[128,128], index: 9, kind: input, shape index: {}]   ;;  %s4006_s10 = inlined_call_operand.vmem [shape: f32[128,1], index: 10, kind: input, shape index: {}]   ;;  %s4007_s11 = inlined_call_operand.hbm [shape: f32[2,32,256], index: 11, kind: output, shape index: {}]  }
   0x1   :  { %4015 = sst [smem:[#allocation14_spill]] %s3996_s0 }
   0x2   :  { %4016 = sst [smem:[#allocation15_spill]] %s3997_s1 }
   0x3   :  { %16 = sst [smem:[#allocation4]] %s4002_s6 }
   0x4   :  { %17 = vsyncpa [#allocation6], 0 }
   0x5   :  { %19 = vsyncpa [#allocation6 + $0x1], 0  ;;  %s3049_s19 = smov 0   ;;  %s3051_s20 = smov 0  }
   0x6   :  { %s3053_s21 = smov 0   ;;  %s3055_s22 = smov 0  }
   0x7   :  { %s3057_s23 = smov 0   ;;  %s3059_s24 = smov 0  }
   0x8   :  { %s3061_s25 = smov 0   ;;  %s3063_s26 = smov 0  }
   0x9   :  { %s3065_s27 = smov 0   ;;  %s3067_s6 = smov 0  }
   0xa LB: > { %4017 = sst [smem:[#allocation8_spill]] %s2937_s19  ;;  %s2397_s28 = sadd.s32 4294967295, %s2973_s6   ;;  %s2973_s6 = sphi %s3067_s6, %s25_s6   ;;  %s2969_s27 = sphi %s3065_s27, %s4039_s27   ;;  %s2965_s26 = sphi %s3063_s26, %s4033_s26   ;;  %s2961_s25 = sphi %s3061_s25, %s4038_s25   ;;  %s2957_s24 = sphi %s3059_s24, %s4037_s24   ;;  %s2953_s23 = sphi %s3057_s23, %s4031_s23   ;;  %s2949_s22 = sphi %s3055_s22, %s4030_s22   ;;  %s2945_s21 = sphi %s3053_s21, %s4036_s21   ;;  %s2941_s20 = sphi %s3051_s20, %s4035_s20   ;;  %s2937_s19 = sphi %s3049_s19, %s4034_s19  }
   0xb   : > { %4018 = sst [smem:[#allocation9_spill]] %s2961_s25  ;;  %s2398_s29 = sadd.s32 4294967294, %s2973_s6  }
   0xc   : > { %4019 = sst [smem:[#allocation10_spill]] %s2965_s26  ;;  %s37_s30 = sadd.s32 1, %s2961_s25 }
   0xd   : > { %p38_p0 = scmp.ge.s32.totalorder %s37_s30, 2  ;;  %s40_s12 = sadd.s32 1, %s2965_s26 }
   0xe   : > { %s44_s13 = sadd.s32 1, %s2969_s27  ;;  %s286_s14 = smul.u32 %s2961_s25, %s2965_s26 }
   0xf   : > { %s4041_s30 = smov (%p38_p0, %s37_s30), 0  ;;  %s4043_s12 = smov (!%p38_p0, %s40_s12), %s2965_s26 }
  0x10   : > { %4020 = sst [smem:[#allocation11_spill]] %s4041_s30  ;;  %p303_p1 = scmp.ne.s32.totalorder %s2945_s21, %s2941_s20 }
  0x11   : > { %p304_p2 = scmp.eq.s32.totalorder %s2397_s28, 7  ;;  %p42_p3 = scmp.ge.s32.totalorder %s4043_s12, 2 }
  0x12   : > { %p309_p4 = scmp.ne.s32.totalorder %s2941_s20, %s2937_s19  ;;  %p310_p6 = scmp.eq.s32.totalorder %s2398_s29, 7 }
  0x13   : > { %p3113_p5 = por %p304_p2, %p303_p1  ;;  %s4045_s12 = smov (%p42_p3, %s4043_s12), 0 }
  0x14   : > { %4022 = sst [smem:[#allocation12_spill]] %s4045_s12  ;;  %s4047_s13 = smov (!%p42_p3, %s44_s13), %s2969_s27 }
  0x15   : > { %s287_s16 = smul.u32 %s4045_s12, %s4041_s30  ;;  %p3122_p7 = por %p310_p6, %p309_p4 }
  0x16   : > { %p46_p8 = scmp.ge.s32.totalorder %s4047_s13, 2  ;;  %p2401_p9 = scmp.ge.s32.totalorder %s2973_s6, 1 }
  0x17   : > { %s4023_s17 = scalar_select %p3122_p7, 1, 0 }
  0x18   : > { %s289_s18 = ssub.s32 %s286_s14, %s287_s16  ;;  %p369_p10 = scmp.lt.s32.totalorder %s2973_s6, 9 }
  0x19   : > { %4024 = sst [smem:[#allocation13_spill]] %s4023_s17  ;;  %s4049_s13 = smov (%p46_p8, %s4047_s13), 0 }
  0x1a   : > { %p370_p11 = pnand %p2401_p9, %p369_p10  ;;  %s288_s28 = ssub.s32 %s2969_s27, %s4049_s13 }
  0x1b   : > { %s290_s26 = sor.u32 %s289_s18, %s288_s28  ;;  %s293_s29 = sadd.s32 1, %s2945_s21 }
  0x1c   : > { %p291_p12 = scmp.eq.s32.totalorder %s290_s26, 0  ;;  %373 = sbr.rel (%p370_p11) target bundleno = 1552 (0x610), region = 64 }
  0x1d   : > { %s4025_s1 = sld [smem:[#allocation15_spill]] (!%p370_p11)  ;;  %p412_p13 = scmp.lt.s32.totalorder (!%p370_p11), %s2957_s24, 1 }
  0x1e   : > { %s3134_s25 = scalar_select %p291_p12, %s2945_s21, %s293_s29  }
  0x1f   : > { %p414_p0 = scmp.lt.s32.totalorder (!%p370_p11), %s2949_s22, 1  ;;  %s4026_s0 = sld [smem:[#allocation14_spill]] (!%p370_p11) }
  0x20   : > { %s4014_s17 = sand.u32 (!%p370_p11), 1, %s2941_s20   ;;  %p2405_p1 = scmp.ne.s32.totalorder (!%p370_p11), %s2953_s23, 0 }
  0x21   : > { %v2975_v2 = vmov 1   ;;  %v2976_v3 = vmov 0   ;;  %v2977_v12 = vmov 2   ;;  %v2978_v19 = vmov 3   ;;  %s413_s28 = scalar_select %p412_p13, %s2957_s24, 1  ;;  %v840_v28 = vld [vmem:[%s3998_s2 + $0x8] sm:$0xff] }
  0x22   : > { %2777 = vset.pattern.permute.xlu0 %v2975_v2  ;;  %2776 = vset.pattern.permute.xlu1 %v2976_v3  ;;  %s415_s29 = scalar_select %p414_p0, %s2949_s22, 1  ;;  %v519_v20 = vlaneseq  ;;  %v843_v34 = vld [vmem:[%s3998_s2 + $0x20] sm:$0xff]  ;;  %v845_v40 = vld [vmem:[%s3998_s2 + $0x30] sm:$0xff]  ;;  %v842_v55 = vld [vmem:[%s3998_s2 + $0x18] sm:$0xff] }
  0x23   : > { %v3139_v0 = vld [vmem:[%s4025_s1 + $0x10] sm:$0xff]  ;;  %v3144_v1 = vld [vmem:[%s4025_s1] sm:$0xff]  ;;  %v426_v4 = vld [vmem:[%s4025_s1 + $0x18] sm:$0xff]  ;;  %s2403_s26 = sshll.u32 %s413_s28, 1  ;;  %p2406_p2 = scmp.ne.s32.totalorder (!%p2405_p1), %s2949_s22, 0 }
  0x24   : > { %451 = vperm.xlu1 %2776, %v3139_v0   ;;  %540 = vperm.xlu0 %2777, %v3144_v1   ;;  %v428_v5 = vld [vmem:[%s4025_s1 + $0x28] sm:$0xff]  ;;  %v430_v6 = vld [vmem:[%s4025_s1 + $0x38] sm:$0xff]  ;;  %v427_v13 = vld [vmem:[%s4025_s1 + $0x20] sm:$0xff]  ;;  %s417_s14 = sadd.s32 %s2403_s26, %s415_s29  ;;  %v3206_v21 = vshrl.u32 %v519_v20, 7  ;;  %s3320_s29 = sshll.u32 %s4014_s17, 5 }
  0x25   : > { %v432_v7 = vld [vmem:[%s4025_s1 + $0x48] sm:$0xff]  ;;  %v434_v8 = vld [vmem:[%s4025_s1 + $0x58] sm:$0xff]  ;;  %v429_v14 = vld [vmem:[%s4025_s1 + $0x30] sm:$0xff]  ;;  %s2404_s30 = sshll.u32 %s417_s14, 2  ;;  %s3496_s26 = scalar_lea.vmem [#allocation5], %s3320_s29 }
  0x26   : > { %v436_v9 = vld [vmem:[%s4025_s1 + $0x68] sm:$0xff]  ;;  %v438_v10 = vld [vmem:[%s4025_s1 + $0x78] sm:$0xff]  ;;  %v431_v15 = vld [vmem:[%s4025_s1 + $0x40] sm:$0xff]  ;;  %s419_s16 = scalar_lea.vmem %s4026_s0, %s2404_s30  ;;  %v605_v22 = vsub.s32 1, %v3206_v21  ;;  %v521_v23 = vsub.s32 0, %v3206_v21 }
  0x27   : > { %v424_v11 = vld [vmem:[%s4025_s1 + $0x8] sm:$0xff]  ;;  %v433_v16 = vld [vmem:[%s4025_s1 + $0x50] sm:$0xff]  ;;  %v435_v17 = vld [vmem:[%s4025_s1 + $0x60] sm:$0xff] }
  0x28   : > { %456 = vperm.xlu1 %2776, %v426_v4   ;;  %552 = vperm.xlu0 %2777, %v426_v4   ;;  %v3192_v18 = vld [vmem:[%s4025_s1 + $0x70] sm:$0xff]  ;;  %v3215_v25 = vld [vmem:[%s419_s16] sm:$0xf]  ;;  %v844_v62 = vld [vmem:[%s3998_s2 + $0x28] sm:$0xff] }
  0x29   : > { %v3221_v27 = vrot.slane %v3215_v25, %v605_v22  ;;  %v3227_v29 = vrot.slane %v3215_v25, %v521_v23  ;;  %v839_v41 = vld [vmem:[%s3998_s2] sm:$0xff]  ;;  %v841_v48 = vld [vmem:[%s3998_s2 + $0x10] sm:$0xff]  ;;  %v852_v20 = vld [vmem:[%s3998_s2 + $0x68] sm:$0xff] }
  0x2a   : > { %v847_v47 = vld [vmem:[%s3998_s2 + $0x40] sm:$0xff]  ;;  %v849_v54 = vld [vmem:[%s3998_s2 + $0x50] sm:$0xff] }
  0x2b   : > { %v851_v61 = vld [vmem:[%s3998_s2 + $0x60] sm:$0xff] }
  0x2c   : > { %466 = vperm.xlu1 %2776, %v428_v5   ;;  %560 = vperm.xlu0 %2777, %v428_v5  }
  0x30   : > { %476 = vperm.xlu1 %2776, %v430_v6   ;;  %568 = vperm.xlu0 %2777, %v430_v6  }
  0x34   : > { %486 = vperm.xlu1 %2776, %v432_v7   ;;  %576 = vperm.xlu0 %2777, %v432_v7  }
  0x38   : > { %496 = vperm.xlu1 %2776, %v434_v8   ;;  %584 = vperm.xlu0 %2777, %v434_v8  }
  0x3c   : > { %506 = vperm.xlu1 %2776, %v436_v9   ;;  %592 = vperm.xlu0 %2777, %v436_v9  }
  0x40   : > { %516 = vperm.xlu1 %2776, %v438_v10   ;;  %600 = vperm.xlu0 %2777, %v438_v10  }
  0x44   : > { %2778 = vset.pattern.permute.xlu1 %v2975_v2  ;;  %2780 = vset.pattern.permute.xlu0 %v2977_v12 }
  0x45   : > { %544 = vperm.xlu1 %2778, %v424_v11   ;;  %644 = vperm.xlu0 %2780, %v424_v11  }
  0x49   : > { %548 = vperm.xlu1 %2778, %v3139_v0   ;;  %656 = vperm.xlu0 %2780, %v427_v13  }
  0x4d   : > { %556 = vperm.xlu1 %2778, %v427_v13   ;;  %664 = vperm.xlu0 %2780, %v429_v14  }
  0x51   : > { %564 = vperm.xlu1 %2778, %v429_v14   ;;  %672 = vperm.xlu0 %2780, %v431_v15  }
  0x55   : > { %572 = vperm.xlu1 %2778, %v431_v15   ;;  %680 = vperm.xlu0 %2780, %v433_v16  }
  0x59   : > { %580 = vperm.xlu1 %2778, %v433_v16   ;;  %688 = vperm.xlu0 %2780, %v435_v17  }
  0x5d   : > { %588 = vperm.xlu1 %2778, %v435_v17   ;;  %696 = vperm.xlu0 %2780, %v3192_v18  }
  0x61   : > { %596 = vperm.xlu1 %2778, %v3192_v18   ;;  %2781 = vset.pattern.permute.xlu0 %v2978_v19 }
  0x62   : > { %740 = vperm.xlu0 %2781, %v3144_v1  }
  0x65   : > { %2779 = vset.pattern.permute.xlu1 %v2977_v12 }
  0x66   : > { %640 = vperm.xlu1 %2779, %v3144_v1   ;;  %752 = vperm.xlu0 %2781, %v426_v4  }
  0x6a   : > { %648 = vperm.xlu1 %2779, %v3139_v0   ;;  %760 = vperm.xlu0 %2781, %v428_v5  }
  0x6e   : > { %652 = vperm.xlu1 %2779, %v426_v4   ;;  %768 = vperm.xlu0 %2781, %v430_v6   ;;  %v853_v4 = vld [vmem:[%s3998_s2 + $0x70] sm:$0xff] }
  0x72   : > { %660 = vperm.xlu1 %2779, %v428_v5   ;;  %776 = vperm.xlu0 %2781, %v432_v7   ;;  %v846_v5 = vld [vmem:[%s3998_s2 + $0x38] sm:$0xff] }
  0x76   : > { %668 = vperm.xlu1 %2779, %v430_v6   ;;  %784 = vperm.xlu0 %2781, %v434_v8  }
  0x7a   : > { %676 = vperm.xlu1 %2779, %v432_v7   ;;  %792 = vperm.xlu0 %2781, %v436_v9  }
  0x7e   : > { %684 = vperm.xlu1 %2779, %v434_v8   ;;  %800 = vperm.xlu0 %2781, %v438_v10  }
  0x82   : > { %692 = vperm.xlu1 %2779, %v436_v9   ;;  %2783 = vset.pattern.permute.xlu0 %v2976_v3 }
  0x83   : > { %441 = vperm.xlu0 %2783, %v3144_v1  }
  0x86   : > { %700 = vperm.xlu1 %2779, %v438_v10  }
  0x87   : > { %446 = vperm.xlu0 %2783, %v424_v11  }
  0x8a   : > { %2782 = vset.pattern.permute.xlu1 %v2978_v19 }
  0x8b   : > { %744 = vperm.xlu1 %2782, %v424_v11   ;;  %461 = vperm.xlu0 %2783, %v427_v13   ;;  %v848_v11 = vld [vmem:[%s3998_s2 + $0x48] sm:$0xff] }
  0x8f   : > { %748 = vperm.xlu1 %2782, %v3139_v0   ;;  %471 = vperm.xlu0 %2783, %v429_v14  }
  0x93   : > { %756 = vperm.xlu1 %2782, %v427_v13   ;;  %481 = vperm.xlu0 %2783, %v431_v15  }
  0x97   : > { %764 = vperm.xlu1 %2782, %v429_v14   ;;  %491 = vperm.xlu0 %2783, %v433_v16  }
  0x9b   : > { %772 = vperm.xlu1 %2782, %v431_v15   ;;  %501 = vperm.xlu0 %2783, %v435_v17   ;;  %v850_v15 = vld [vmem:[%s3998_s2 + $0x58] sm:$0xff] }
  0x9f   : > { %v3213_v24 = vpop.permute.xlu1 %451  ;;  %780 = vperm.xlu1 %2782, %v433_v16   ;;  %511 = vperm.xlu0 %2783, %v3192_v18   ;;  %v3218_v26 = vpop.permute.xlu0 %540 }
  0xa3   : > { %v457_v30 = vpop.permute.xlu1 %456  ;;  %788 = vperm.xlu1 %2782, %v435_v17   ;;  %862 = vperm.xlu0 %2783, %v840_v28   ;;  %v553_v31 = vpop.permute.xlu0 %552 }
  0xa4   : > { %v526_v32 = vmul.f32 %v3227_v29, %v457_v30  ;;  %v610_v33 = vmul.f32 %v3221_v27, %v553_v31  ;;  %v854_v30 = vld [vmem:[%s3998_s2 + $0x78] sm:$0xff] }
  0xa6   : > { %v3234_v35 = vadd.f32 %v610_v33, %v526_v32 }
  0xa7   : > { %v467_v36 = vpop.permute.xlu1 %466  ;;  %796 = vperm.xlu1 %2782, %v3192_v18   ;;  %877 = vperm.xlu0 %2783, %v843_v34   ;;  %v561_v37 = vpop.permute.xlu0 %560  ;;  %v525_v18 = vmul.f32 %v3227_v29, %v3213_v24 }
  0xa8   : > { %v528_v38 = vmul.f32 %v3227_v29, %v467_v36  ;;  %v612_v39 = vmul.f32 %v3221_v27, %v561_v37 }
  0xaa   : > { %v3245_v42 = vadd.f32 %v612_v39, %v528_v38 }
  0xab   : > { %v477_v43 = vpop.permute.xlu1 %476  ;;  %2784 = vset.pattern.permute.xlu1 %v2976_v3  ;;  %887 = vperm.xlu0 %2783, %v845_v40   ;;  %v569_v44 = vpop.permute.xlu0 %568 }
  0xac   : > { %v530_v45 = vmul.f32 %v3227_v29, %v477_v43  ;;  %v614_v46 = vmul.f32 %v3221_v27, %v569_v44  ;;  %857 = vperm.xlu1 %2784, %v839_v41   ;;  %v705_v41 = vsub.s32 2, %v3206_v21 }
  0xae   : > { %v3256_v49 = vadd.f32 %v614_v46, %v530_v45  ;;  %v805_v45 = vsub.s32 3, %v3206_v21  ;;  %v3343_v46 = vrot.slane %v3215_v25, %v705_v41 }
  0xaf   : > { %v487_v50 = vpop.permute.xlu1 %486  ;;  %897 = vperm.xlu0 %2783, %v847_v47   ;;  %v577_v51 = vpop.permute.xlu0 %576 }
  0xb0   : > { %v532_v52 = vmul.f32 %v3227_v29, %v487_v50  ;;  %v616_v53 = vmul.f32 %v3221_v27, %v577_v51  ;;  %867 = vperm.xlu1 %2784, %v841_v48   ;;  %v3346_v50 = vrot.slane %v3215_v25, %v805_v45 }
  0xb2   : > { %v3266_v56 = vadd.f32 %v616_v53, %v532_v52 }
  0xb3   : > { %v497_v57 = vpop.permute.xlu1 %496  ;;  %907 = vperm.xlu0 %2783, %v849_v54   ;;  %v585_v58 = vpop.permute.xlu0 %584 }
  0xb4   : > { %v534_v59 = vmul.f32 %v3227_v29, %v497_v57  ;;  %v618_v60 = vmul.f32 %v3221_v27, %v585_v58  ;;  %872 = vperm.xlu1 %2784, %v842_v55  }
  0xb6   : > { %v3276_v63 = vadd.f32 %v618_v60, %v534_v59 }
  0xb7   : > { %v507_v0 = vpop.permute.xlu1 %506  ;;  %917 = vperm.xlu0 %2783, %v851_v61   ;;  %v593_v1 = vpop.permute.xlu0 %592 }
  0xb8   : > { %v536_v2 = vmul.f32 %v3227_v29, %v507_v0  ;;  %v620_v3 = vmul.f32 %v3221_v27, %v593_v1  ;;  %882 = vperm.xlu1 %2784, %v844_v62  }
  0xba   : > { %v3286_v6 = vadd.f32 %v620_v3, %v536_v2 }
  0xbb   : > { %v517_v7 = vpop.permute.xlu1 %516  ;;  %927 = vperm.xlu0 %2783, %v853_v4   ;;  %v601_v8 = vpop.permute.xlu0 %600 }
  0xbc   : > { %v538_v9 = vmul.f32 %v3227_v29, %v517_v7  ;;  %v622_v10 = vmul.f32 %v3221_v27, %v601_v8  ;;  %892 = vperm.xlu1 %2784, %v846_v5  }
  0xbe   : > { %v3293_v12 = vadd.f32 %v622_v10, %v538_v9 }
  0xc0   : > { %v3295_v13 = vpop.permute.xlu1 %544  ;;  %902 = vperm.xlu1 %2784, %v848_v11   ;;  %v3297_v14 = vpop.permute.xlu0 %644 }
  0xc4   : > { %v549_v16 = vpop.permute.xlu1 %548  ;;  %912 = vperm.xlu1 %2784, %v850_v15   ;;  %v3302_v17 = vpop.permute.xlu0 %656 }
  0xc5   : > { %v609_v19 = vmul.f32 %v3221_v27, %v549_v16 }
  0xc7   : > { %v625_v22 = vadd.f32 %v609_v19, %v525_v18 }
  0xc8   : > { %v3310_v23 = vpop.permute.xlu1 %556  ;;  %922 = vperm.xlu1 %2784, %v852_v20   ;;  %v3312_v28 = vpop.permute.xlu0 %664 }
  0xcc   : > { %v3322_v24 = vpop.permute.xlu1 %564  ;;  %932 = vperm.xlu1 %2784, %v854_v30   ;;  %v3324_v31 = vpop.permute.xlu0 %672 }
  0xd0   : > { %v3326_v32 = vpop.permute.xlu1 %572  ;;  %v3328_v33 = vpop.permute.xlu0 %680 }
  0xd4   : > { %v3330_v34 = vpop.permute.xlu1 %580  ;;  %v3332_v36 = vpop.permute.xlu0 %688 }
  0xd8   : > { %v3334_v37 = vpop.permute.xlu1 %588  ;;  %v3336_v38 = vpop.permute.xlu0 %696 }
  0xdc   : > { %v3338_v39 = vpop.permute.xlu1 %596 }
  0xdd   : > { %v741_v40 = vpop.permute.xlu0 %740 }
  0xe1   : > { %v641_v43 = vpop.permute.xlu1 %640  ;;  %v753_v44 = vpop.permute.xlu0 %752 }
  0xe2   : > { %v810_v55 = vmul.f32 %v3346_v50, %v753_v44 }
  0xe5   : > { %v649_v47 = vpop.permute.xlu1 %648  ;;  %v761_v48 = vpop.permute.xlu0 %760 }
  0xe6   : > { %v709_v51 = vmul.f32 %v3343_v46, %v649_v47  ;;  %v812_v60 = vmul.f32 %v3346_v50, %v761_v48  ;;  %v707_v47 = vmul.f32 %v3343_v46, %v641_v43 }
  0xe8   : > { %v3349_v52 = vadd.f32 %v709_v51, %v625_v22 }
  0xe9   : > { %v653_v53 = vpop.permute.xlu1 %652  ;;  %v769_v54 = vpop.permute.xlu0 %768 }
  0xea   : > { %v710_v57 = vmul.f32 %v3343_v46, %v653_v53  ;;  %v814_v4 = vmul.f32 %v3346_v50, %v769_v54  ;;  %v608_v53 = vmul.f32 %v3221_v27, %v3295_v13  ;;  %v807_v54 = vmul.f32 %v3346_v50, %v741_v40 }
  0xeb   : > { %v711_v13 = vmul.f32 %v3343_v46, %v3302_v17 }
  0xec   : > { %v726_v21 = vadd.f32 %v710_v57, %v3234_v35 }
  0xed   : > { %v661_v58 = vpop.permute.xlu1 %660  ;;  %v777_v59 = vpop.permute.xlu0 %776 }
  0xee   : > { %v712_v61 = vmul.f32 %v3343_v46, %v661_v58  ;;  %v3356_v25 = vadd.f32 %v810_v55, %v726_v21  ;;  %v816_v10 = vmul.f32 %v3346_v50, %v777_v59  ;;  %v611_v59 = vmul.f32 %v3221_v27, %v3310_v23 }
  0xf0   : > { %v728_v62 = vadd.f32 %v712_v61, %v3245_v42 }
  0xf1   : > { %v669_v0 = vpop.permute.xlu1 %668  ;;  %v785_v1 = vpop.permute.xlu0 %784 }
  0xf2   : > { %v714_v2 = vmul.f32 %v3343_v46, %v669_v0  ;;  %v3360_v3 = vadd.f32 %v812_v60, %v728_v62 }
  0xf4   : > { %v730_v35 = vadd.f32 %v714_v2, %v3256_v49  ;;  %v818_v49 = vmul.f32 %v3346_v50, %v785_v1 }
  0xf5   : > { %v677_v5 = vpop.permute.xlu1 %676  ;;  %v3364_v7 = vpop.permute.xlu0 %792 }
  0xf6   : > { %v716_v8 = vmul.f32 %v3343_v46, %v677_v5  ;;  %v3367_v9 = vadd.f32 %v814_v4, %v730_v35  ;;  %v713_v4 = vmul.f32 %v3343_v46, %v3312_v28 }
  0xf8   : > { %v732_v42 = vadd.f32 %v716_v8, %v3266_v56  ;;  %v607_v56 = vmul.f32 %v3221_v27, %v3218_v26  ;;  %v708_v26 = vmul.f32 %v3343_v46, %v3297_v14  ;;  %v613_v14 = vmul.f32 %v3221_v27, %v3322_v24 }
  0xf9   : > { %v685_v11 = vpop.permute.xlu1 %684  ;;  %v3371_v15 = vpop.permute.xlu0 %800  ;;  %v615_v8 = vmul.f32 %v3221_v27, %v3326_v32 }
  0xfa   : > { %v718_v16 = vmul.f32 %v3343_v46, %v685_v11  ;;  %v3374_v18 = vadd.f32 %v816_v10, %v732_v42  ;;  %v715_v42 = vmul.f32 %v3343_v46, %v3324_v31 }
  0xfc   : > { %v734_v19 = vadd.f32 %v718_v16, %v3276_v63 }
  0xfd   : > { %v693_v20 = vpop.permute.xlu1 %692 }
  0xfe   : > { %v720_v22 = vmul.f32 %v3343_v46, %v693_v20  ;;  %v442_v30 = vpop.permute.xlu0 %441  ;;  %v3379_v41 = vadd.f32 %v818_v49, %v734_v19  ;;  %v617_v49 = vmul.f32 %v3221_v27, %v3330_v34  ;;  %v717_v20 = vmul.f32 %v3343_v46, %v3328_v33 }
  0xff   : > { %v523_v44 = vmul.f32 %v3227_v29, %v442_v30  ;;  %v621_v33 = vmul.f32 %v3221_v27, %v3338_v39 }
 0x100   : > { %v3385_v45 = vadd.f32 %v720_v22, %v3286_v6 }
 0x101   : > { %v623_v48 = vadd.f32 %v607_v56, %v523_v44  ;;  %v3388_v51 = vpop.permute.xlu1 %700  ;;  %v619_v56 = vmul.f32 %v3221_v27, %v3334_v37  ;;  %v721_v37 = vmul.f32 %v3343_v46, %v3336_v38 }
 0x102   : > { %v447_v63 = vpop.permute.xlu0 %446 }
 0x103   : > { %v524_v55 = vmul.f32 %v3227_v29, %v447_v63  ;;  %v723_v57 = vadd.f32 %v707_v47, %v623_v48  ;;  %v719_v47 = vmul.f32 %v3343_v46, %v3332_v36 }
 0x105   : > { %v624_v21 = vadd.f32 %v608_v53, %v524_v55  ;;  %v3396_v6 = vadd.f32 %v807_v54, %v723_v57 }
 0x106   : > { %v745_v58 = vpop.permute.xlu1 %744  ;;  %v462_v43 = vpop.permute.xlu0 %461 }
 0x107   : > { %v527_v60 = vmul.f32 %v3227_v29, %v462_v43  ;;  %v724_v61 = vadd.f32 %v708_v26, %v624_v21  ;;  %v808_v34 = vmul.f32 %v3346_v50, %v745_v58 }
 0x109   : > { %v627_v40 = vadd.f32 %v611_v59, %v527_v60  ;;  %v824_v21 = vadd.f32 %v808_v34, %v724_v61 }
 0x10a   : > { %v749_v62 = vpop.permute.xlu1 %748  ;;  %v472_v0 = vpop.permute.xlu0 %471 }
 0x10b   : > { %v529_v1 = vmul.f32 %v3227_v29, %v472_v0  ;;  %v727_v2 = vadd.f32 %v711_v13, %v627_v40  ;;  %v809_v61 = vmul.f32 %v3346_v50, %v749_v62 }
 0x10d   : > { %v629_v35 = vadd.f32 %v613_v14, %v529_v1 }
 0x10e   : > { %v757_v23 = vpop.permute.xlu1 %756  ;;  %v482_v5 = vpop.permute.xlu0 %481 }
 0x10f   : > { %v531_v17 = vmul.f32 %v3227_v29, %v482_v5  ;;  %v729_v10 = vadd.f32 %v713_v4, %v629_v35  ;;  %v811_v57 = vmul.f32 %v3346_v50, %v757_v23 }
 0x111   : > { %v631_v11 = vadd.f32 %v615_v8, %v531_v17  ;;  %v827_v40 = vadd.f32 %v811_v57, %v727_v2 }
 0x112   : > { %v765_v24 = vpop.permute.xlu1 %764  ;;  %v492_v16 = vpop.permute.xlu0 %491 }
 0x113   : > { %v533_v28 = vmul.f32 %v3227_v29, %v492_v16  ;;  %v731_v19 = vadd.f32 %v715_v42, %v631_v11  ;;  %v813_v60 = vmul.f32 %v3346_v50, %v765_v24  ;;  %v825_v11 = vadd.f32 %v809_v61, %v3349_v52 }
 0x115   : > { %v633_v22 = vadd.f32 %v617_v49, %v533_v28  ;;  %v829_v14 = vadd.f32 %v813_v60, %v729_v10 }
 0x116   : > { %v773_v32 = vpop.permute.xlu1 %772  ;;  %v502_v30 = vpop.permute.xlu0 %501 }
 0x117   : > { %v535_v31 = vmul.f32 %v3227_v29, %v502_v30  ;;  %v733_v44 = vadd.f32 %v717_v20, %v633_v22  ;;  %v815_v0 = vmul.f32 %v3346_v50, %v773_v32 }
 0x119   : > { %v635_v48 = vadd.f32 %v619_v56, %v535_v31  ;;  %v831_v8 = vadd.f32 %v815_v0, %v731_v19 }
 0x11a   : > { %v781_v63 = vpop.permute.xlu1 %780  ;;  %v512_v53 = vpop.permute.xlu0 %511 }
 0x11b   : > { %v537_v54 = vmul.f32 %v3227_v29, %v512_v53  ;;  %v735_v55 = vadd.f32 %v719_v47, %v635_v48  ;;  %v817_v5 = vmul.f32 %v3346_v50, %v781_v63 }
 0x11d   : > { %v637_v26 = vadd.f32 %v621_v33, %v537_v54  ;;  %v833_v28 = vadd.f32 %v817_v5, %v733_v44 }
 0x11e   : > { %v789_v43 = vpop.permute.xlu1 %788  ;;  %v863_v36 = vpop.permute.xlu0 %862 }
 0x11f   : > { %v936_v59 = vadd.f32 %v863_v36, %v824_v21  ;;  %v737_v58 = vadd.f32 %v721_v37, %v637_v26  ;;  %v819_v16 = vmul.f32 %v3346_v50, %v789_v43  ;;  %v722_v43 = vmul.f32 %v3343_v46, %v3388_v51 }
 0x120   : > { %v822_v46 = vmul.f32 %v3346_v50, %v3371_v15 }
 0x121   : > { %v3431_v13 = vmax.f32 %v936_v59, 0.0  ;;  %v835_v56 = vadd.f32 %v819_v16, %v735_v55  ;;  %v738_v60 = vadd.f32 %v722_v43, %v3293_v12 }
 0x122   : > { %v797_v27 = vpop.permute.xlu1 %796  ;;  %v878_v39 = vpop.permute.xlu0 %877 }
 0x123   : > { %v3433_v29 = vadd.f32 %v878_v39, %v827_v40  ;;  %v821_v30 = vmul.f32 %v3346_v50, %v797_v27  ;;  %v838_v0 = vadd.f32 %v822_v46, %v738_v60 }
 0x125   : > { %v955_v38 = vmax.f32 %v3433_v29, 0.0  ;;  %v837_v53 = vadd.f32 %v821_v30, %v737_v58  ;;  %v820_v58 = vmul.f32 %v3346_v50, %v3364_v7 }
 0x126   : > { %v888_v1 = vpop.permute.xlu0 %887 }
 0x127   : > { %v3438_v4 = vadd.f32 %v888_v1, %v829_v14  ;;  %v858_v35 = vpop.permute.xlu1 %857 }
 0x128   : > { %v935_v23 = vadd.f32 %v858_v35, %v3396_v6 }
 0x129   : > { %v957_v2 = vmax.f32 %v3438_v4, 0.0 }
 0x12a   : > { %v3443_v17 = vmax.f32 %v935_v23, 0.0  ;;  %v898_v42 = vpop.permute.xlu0 %897 }
 0x12b   : > { %v3446_v24 = vadd.f32 %v898_v42, %v831_v8  ;;  %v868_v10 = vpop.permute.xlu1 %867 }
 0x12c   : > { %v937_v62 = vadd.f32 %v868_v10, %v825_v11 }
 0x12d   : > { %v959_v49 = vmax.f32 %v3446_v24, 0.0 }
 0x12e   : > { %v3450_v6 = vmax.f32 %v937_v62, 0.0  ;;  %v908_v20 = vpop.permute.xlu0 %907 }
 0x12f   : > { %v3452_v22 = vadd.f32 %v908_v20, %v833_v28  ;;  %v873_v19 = vpop.permute.xlu1 %872 }
 0x130   : > { %v938_v32 = vadd.f32 %v873_v19, %v3356_v25 }
 0x131   : > { %v961_v52 = vmax.f32 %v3452_v22, 0.0 }
 0x132   : > { %v3457_v31 = vmax.f32 %v938_v32, 0.0  ;;  %v918_v47 = vpop.permute.xlu0 %917 }
 0x133   : > { %v3459_v34 = vadd.f32 %v918_v47, %v835_v56  ;;  %v883_v48 = vpop.permute.xlu1 %882 }
 0x134   : > { %v3462_v44 = vadd.f32 %v883_v48, %v3360_v3 }
 0x135   : > { %v963_v63 = vmax.f32 %v3459_v34, 0.0 }
 0x136   : > { %v956_v33 = vmax.f32 %v3462_v44, 0.0  ;;  %v928_v25 = vpop.permute.xlu0 %927 }
 0x137   : > { %v3466_v54 = vadd.f32 %v928_v25, %v837_v53  ;;  %v893_v37 = vpop.permute.xlu1 %892 }
 0x138   : > { %v3469_v55 = vadd.f32 %v893_v37, %v3367_v9 }
 0x139   : > { %v965_v57 = vmax.f32 %v3466_v54, 0.0 }
 0x13a   : > { %v958_v26 = vmax.f32 %v3469_v55, 0.0 }
 0x13b   : > { %v903_v21 = vpop.permute.xlu1 %902 }
 0x13c   : > { %v3474_v3 = vadd.f32 %v903_v21, %v3374_v18  ;;  %v836_v18 = vadd.f32 %v820_v58, %v3385_v45 }
 0x13e   : > { %v960_v36 = vmax.f32 %v3474_v3, 0.0 }
 0x13f   : > { %v913_v59 = vpop.permute.xlu1 %912 }
 0x140   : > { %v3482_v9 = vadd.f32 %v913_v59, %v3379_v41 }
 0x142   : > { %v962_v40 = vmax.f32 %v3482_v9, 0.0 }
 0x143   : > { %v923_v27 = vpop.permute.xlu1 %922 }
 0x144   : > { %v3489_v51 = vadd.f32 %v923_v27, %v836_v18 }
 0x146   : > { %v964_v39 = vmax.f32 %v3489_v51, 0.0  ;;  %970 = sbr.rel (%p2405_p1) target bundleno = 1196 (0x4ac), region = 68 }
 0x147   : > { %v933_v14 = vpop.permute.xlu1 %932 }
 0x148   : > { %v3492_v7 = vadd.f32 %v933_v14, %v838_v0 }
 0x14a   : > { %v966_v41 = vmax.f32 %v3492_v7, 0.0 }
 0x14b   : > { %974 = sbr.rel (%p2406_p2) target bundleno = 345 (0x159), region = 72 }
 0x150   : > { %vm975_vm0 = vcmask 7168   ;;  %v2979_v12 = vmov 0.0  }
 0x151   : > { %976 = vst.msk [vmem:[#allocation2] sm:$0xff] %vm975_vm0, %v2979_v12  ;;  %977 = vst.msk [vmem:[#allocation2 + $0x8] sm:$0xff] %vm975_vm0, %v2979_v12 }
 0x152   : > { %978 = vst.msk [vmem:[#allocation2 + $0x10] sm:$0xff] %vm975_vm0, %v2979_v12  ;;  %979 = vst.msk [vmem:[#allocation2 + $0x18] sm:$0xff] %vm975_vm0, %v2979_v12 }
 0x153   : > { %980 = vst.msk [vmem:[#allocation2 + $0x20] sm:$0xff] %vm975_vm0, %v2979_v12  ;;  %981 = vst.msk [vmem:[#allocation2 + $0x28] sm:$0xff] %vm975_vm0, %v2979_v12 }
 0x154   : > { %982 = vst.msk [vmem:[#allocation2 + $0x30] sm:$0xff] %vm975_vm0, %v2979_v12  ;;  %983 = vst.msk [vmem:[#allocation2 + $0x38] sm:$0xff] %vm975_vm0, %v2979_v12 }
 0x155   : > { %984 = vst.msk [vmem:[#allocation2 + $0x40] sm:$0xff] %vm975_vm0, %v2979_v12  ;;  %985 = vst.msk [vmem:[#allocation2 + $0x48] sm:$0xff] %vm975_vm0, %v2979_v12 }
 0x156   : > { %986 = vst.msk [vmem:[#allocation2 + $0x50] sm:$0xff] %vm975_vm0, %v2979_v12  ;;  %987 = vst.msk [vmem:[#allocation2 + $0x58] sm:$0xff] %vm975_vm0, %v2979_v12 }
 0x157   : > { %988 = vst.msk [vmem:[#allocation2 + $0x60] sm:$0xff] %vm975_vm0, %v2979_v12  ;;  %989 = vst.msk [vmem:[#allocation2 + $0x68] sm:$0xff] %vm975_vm0, %v2979_v12 }
 0x158   : > { %990 = vst.msk [vmem:[#allocation2 + $0x70] sm:$0xff] %vm975_vm0, %v2979_v12  ;;  %991 = vst.msk [vmem:[#allocation2 + $0x78] sm:$0xff] %vm975_vm0, %v2979_v12 }
 0x159 PF: > { %1012 = vadd.xlane.f32.xlu1 %v3450_v6  ;;  %1008 = vadd.xlane.f32.xlu0 %v3443_v17  ;;  %v994_v50 = vld [vmem:[#allocation2 + $0x10] sm:$0xff]  ;;  %v992_v15 = vld [vmem:[#allocation2] sm:$0xff]  ;;  %vm1056_vm1 = vcmask 7168   ;;  %v995_v23 = vld [vmem:[#allocation2 + $0x18] sm:$0xff]  ;;  %p2407_p3 = scmp.ne.s32.totalorder %s2949_s22, 1 }
 0x15a   : > { %v993_v5 = vld [vmem:[#allocation2 + $0x8] sm:$0xff]  ;;  %v996_v16 = vld [vmem:[#allocation2 + $0x20] sm:$0xff] }
 0x15b   : > { %v997_v62 = vld [vmem:[#allocation2 + $0x28] sm:$0xff]  ;;  %v999_v30 = vld [vmem:[#allocation2 + $0x38] sm:$0xff]  ;;  %v998_v56 = vld [vmem:[#allocation2 + $0x30] sm:$0xff] }
 0x15c   : > { %v1001_v37 = vld [vmem:[#allocation2 + $0x48] sm:$0xff]  ;;  %v1000_v21 = vld [vmem:[#allocation2 + $0x40] sm:$0xff] }
 0x15d   : > { %1014 = vadd.xlane.f32.xlu1 %v3457_v31  ;;  %1010 = vadd.xlane.f32.xlu0 %v3431_v13  ;;  %v1003_v18 = vld [vmem:[#allocation2 + $0x58] sm:$0xff]  ;;  %v1002_v27 = vld [vmem:[#allocation2 + $0x50] sm:$0xff] }
 0x161   : > { %1018 = vadd.xlane.f32.xlu1 %v956_v33  ;;  %1016 = vadd.xlane.f32.xlu0 %v955_v38 }
 0x165   : > { %1022 = vadd.xlane.f32.xlu1 %v958_v26  ;;  %1020 = vadd.xlane.f32.xlu0 %v957_v2 }
 0x169   : > { %1026 = vadd.xlane.f32.xlu1 %v960_v36  ;;  %1024 = vadd.xlane.f32.xlu0 %v959_v49 }
 0x16d   : > { %1030 = vadd.xlane.f32.xlu1 %v962_v40  ;;  %1028 = vadd.xlane.f32.xlu0 %v961_v52 }
 0x171   : > { %1034 = vadd.xlane.f32.xlu1 %v964_v39  ;;  %1032 = vadd.xlane.f32.xlu0 %v963_v63 }
 0x175   : > { %1038 = vadd.xlane.f32.xlu1 %v966_v41  ;;  %1036 = vadd.xlane.f32.xlu0 %v965_v57 }
 0x1e2   : > { %v1013_v45 = vpop.xlane.xlu1 %1012  ;;  %v1009_v61 = vpop.xlane.xlu0 %1008 }
 0x1e3   : > { %v1042_v1 = vadd.f32 %v1013_v45, %v994_v50  ;;  %v1040_v35 = vadd.f32 %v1009_v61, %v992_v15  ;;  %v1005_v50 = vld [vmem:[#allocation2 + $0x68] sm:$0xff]  ;;  %v1004_v15 = vld [vmem:[#allocation2 + $0x60] sm:$0xff] }
 0x1e5   : > { %1059 = vst.msk [vmem:[#allocation2 + $0x10] sm:$0xff] %vm1056_vm1, %v1042_v1  ;;  %1057 = vst.msk [vmem:[#allocation2] sm:$0xff] %vm1056_vm1, %v1040_v35 }
 0x1e6   : > { %v1015_v8 = vpop.xlane.xlu1 %1014  ;;  %v1011_v42 = vpop.xlane.xlu0 %1010 }
 0x1e7   : > { %v1043_v11 = vadd.f32 %v1015_v8, %v995_v23  ;;  %v1041_v10 = vadd.f32 %v1011_v42, %v993_v5  ;;  %v1007_v23 = vld [vmem:[#allocation2 + $0x78] sm:$0xff]  ;;  %v1006_v5 = vld [vmem:[#allocation2 + $0x70] sm:$0xff] }
 0x1e9   : > { %1060 = vst.msk [vmem:[#allocation2 + $0x18] sm:$0xff] %vm1056_vm1, %v1043_v11  ;;  %1058 = vst.msk [vmem:[#allocation2 + $0x8] sm:$0xff] %vm1056_vm1, %v1041_v10 }
 0x1ea   : > { %v1019_v28 = vpop.xlane.xlu1 %1018  ;;  %v1017_v20 = vpop.xlane.xlu0 %1016 }
 0x1eb   : > { %v1045_v19 = vadd.f32 %v1019_v28, %v997_v62  ;;  %v1044_v32 = vadd.f32 %v1017_v20, %v996_v16 }
 0x1ed   : > { %1062 = vst.msk [vmem:[#allocation2 + $0x28] sm:$0xff] %vm1056_vm1, %v1045_v19  ;;  %1061 = vst.msk [vmem:[#allocation2 + $0x20] sm:$0xff] %vm1056_vm1, %v1044_v32 }
 0x1ee   : > { %v1023_v47 = vpop.xlane.xlu1 %1022  ;;  %v1021_v48 = vpop.xlane.xlu0 %1020 }
 0x1ef   : > { %v1047_v53 = vadd.f32 %v1023_v47, %v999_v30  ;;  %v1046_v25 = vadd.f32 %v1021_v48, %v998_v56 }
 0x1f1   : > { %1064 = vst.msk [vmem:[#allocation2 + $0x38] sm:$0xff] %vm1056_vm1, %v1047_v53  ;;  %1063 = vst.msk [vmem:[#allocation2 + $0x30] sm:$0xff] %vm1056_vm1, %v1046_v25 }
 0x1f2   : > { %v1027_v43 = vpop.xlane.xlu1 %1026  ;;  %v1025_v59 = vpop.xlane.xlu0 %1024 }
 0x1f3   : > { %v1049_v58 = vadd.f32 %v1027_v43, %v1001_v37  ;;  %v1048_v60 = vadd.f32 %v1025_v59, %v1000_v21 }
 0x1f5   : > { %1066 = vst.msk [vmem:[#allocation2 + $0x48] sm:$0xff] %vm1056_vm1, %v1049_v58  ;;  %1065 = vst.msk [vmem:[#allocation2 + $0x40] sm:$0xff] %vm1056_vm1, %v1048_v60 }
 0x1f6   : > { %v1031_v46 = vpop.xlane.xlu1 %1030  ;;  %v1029_v0 = vpop.xlane.xlu0 %1028 }
 0x1f7   : > { %v1051_v14 = vadd.f32 %v1031_v46, %v1003_v18  ;;  %v1050_v12 = vadd.f32 %v1029_v0, %v1002_v27 }
 0x1f9   : > { %1068 = vst.msk [vmem:[#allocation2 + $0x58] sm:$0xff] %vm1056_vm1, %v1051_v14  ;;  %1067 = vst.msk [vmem:[#allocation2 + $0x50] sm:$0xff] %vm1056_vm1, %v1050_v12 }
 0x1fa   : > { %v1035_v45 = vpop.xlane.xlu1 %1034  ;;  %v1033_v61 = vpop.xlane.xlu0 %1032 }
 0x1fb   : > { %v1053_v1 = vadd.f32 %v1035_v45, %v1005_v50  ;;  %v1052_v35 = vadd.f32 %v1033_v61, %v1004_v15 }
 0x1fd   : > { %1070 = vst.msk [vmem:[#allocation2 + $0x68] sm:$0xff] %vm1056_vm1, %v1053_v1  ;;  %1069 = vst.msk [vmem:[#allocation2 + $0x60] sm:$0xff] %vm1056_vm1, %v1052_v35  ;;  %1076 = sbr.rel (%p2407_p3) target bundleno = 1196 (0x4ac), region = 76 }
 0x1fe   : > { %v1039_v8 = vpop.xlane.xlu1 %1038  ;;  %v1037_v42 = vpop.xlane.xlu0 %1036 }
 0x1ff   : > { %v1055_v11 = vadd.f32 %v1039_v8, %v1007_v23  ;;  %v1054_v10 = vadd.f32 %v1037_v42, %v1006_v5 }
 0x201   : > { %1072 = vst.msk [vmem:[#allocation2 + $0x78] sm:$0xff] %vm1056_vm1, %v1055_v11  ;;  %1071 = vst.msk [vmem:[#allocation2 + $0x70] sm:$0xff] %vm1056_vm1, %v1054_v10 }
 0x202   : > { %v2980_v20 = vmov 0   ;;  %v1088_v48 = vld [vmem:[#allocation2 + $0x58] sm:$0xff]  ;;  %v1087_v53 = vld [vmem:[#allocation2 + $0x50] sm:$0xff]  ;;  %v1086_v21 = vld [vmem:[#allocation2 + $0x48] sm:$0xff] }
 0x203   : > { %2786 = vset.pattern.permute.xlu1 %v2980_v20  ;;  %2785 = vset.pattern.permute.xlu0 %v2980_v20  ;;  %v1104_v25 = vmul.f32 0.00390625, %v1088_v48  ;;  %v1103_v37 = vmul.f32 0.00390625, %v1087_v53  ;;  %v1085_v43 = vld [vmem:[#allocation2 + $0x40] sm:$0xff]  ;;  %v1102_v59 = vmul.f32 0.00390625, %v1086_v21  ;;  %v1084_v60 = vld [vmem:[#allocation2 + $0x38] sm:$0xff]  ;;  %v1083_v18 = vld [vmem:[#allocation2 + $0x30] sm:$0xff] }
 0x204   : > { %v1090_v16 = vld [vmem:[#allocation2 + $0x68] sm:$0xff]  ;;  %v1089_v30 = vld [vmem:[#allocation2 + $0x60] sm:$0xff]  ;;  %v1101_v58 = vmul.f32 0.00390625, %v1085_v43  ;;  %v1100_v27 = vmul.f32 0.00390625, %v1084_v60  ;;  %v1099_v46 = vmul.f32 0.00390625, %v1083_v18  ;;  %v1080_v15 = vld [vmem:[#allocation2 + $0x18] sm:$0xff] }
 0x205   : > { %v1106_v32 = vmul.f32 0.00390625, %v1090_v16  ;;  %v1105_v47 = vmul.f32 0.00390625, %v1089_v30  ;;  %v1082_v0 = vld [vmem:[#allocation2 + $0x28] sm:$0xff]  ;;  %v1081_v14 = vld [vmem:[#allocation2 + $0x20] sm:$0xff]  ;;  %v1079_v45 = vld [vmem:[#allocation2 + $0x10] sm:$0xff]  ;;  %v1096_v61 = vmul.f32 0.00390625, %v1080_v15 }
 0x206   : > { %v1098_v12 = vmul.f32 0.00390625, %v1082_v0  ;;  %v1097_v50 = vmul.f32 0.00390625, %v1081_v14  ;;  %v1095_v1 = vmul.f32 0.00390625, %v1079_v45  ;;  %v1078_v35 = vld [vmem:[#allocation2 + $0x8] sm:$0xff]  ;;  %v1077_v23 = vld [vmem:[#allocation2] sm:$0xff]  ;;  %v1220_v11 = vld [vmem:[%s4004_s8 + $0x78] sm:$0xff] }
 0x207   : > { %1176 = vperm.xlu1 %2786, %v1106_v32   ;;  %v1094_v5 = vmul.f32 0.00390625, %v1078_v35  ;;  %v1093_v8 = vmul.f32 0.00390625, %v1077_v23  ;;  %v1189_v42 = vld [vmem:[%s4003_s7] sm:$0xff]  ;;  %v1219_v10 = vld [vmem:[%s4004_s8 + $0x70] sm:$0xff]  ;;  %v1212_v30 = vld [vmem:[%s4004_s8 + $0x38] sm:$0xff] }
 0x208   : > { %v1092_v62 = vld [vmem:[#allocation2 + $0x78] sm:$0xff]  ;;  %v1091_v28 = vld [vmem:[#allocation2 + $0x70] sm:$0xff]  ;;  %2551 = vmatprep.mubr.f32.mxu0 %v1189_v42  ;;  %v1217_v16 = vld [vmem:[%s4004_s8 + $0x60] sm:$0xff] }
 0x209   : > { %v1108_v19 = vmul.f32 0.00390625, %v1092_v62  ;;  %v1107_v56 = vmul.f32 0.00390625, %v1091_v28  ;;  %v1218_v62 = vld [vmem:[%s4004_s8 + $0x68] sm:$0xff]  ;;  %v1216_v28 = vld [vmem:[%s4004_s8 + $0x58] sm:$0xff]  ;;  %v1215_v20 = vld [vmem:[%s4004_s8 + $0x50] sm:$0xff] }
 0x20a   : > { %v1213_v32 = vld [vmem:[%s4004_s8 + $0x40] sm:$0xff]  ;;  %v1208_v53 = vld [vmem:[%s4004_s8 + $0x18] sm:$0xff] }
 0x20b   : > { %1186 = vperm.xlu0 %2785, %v1108_v19   ;;  %1171 = vperm.xlu1 %2786, %v1105_v47   ;;  %v1214_v19 = vld [vmem:[%s4004_s8 + $0x48] sm:$0xff]  ;;  %v1209_v48 = vld [vmem:[%s4004_s8 + $0x20] sm:$0xff]  ;;  %v1481_v60 = vld [vmem:[%s4006_s10 + $0x18] sm:$0xff] }
 0x20c   : > { %v1210_v47 = vld [vmem:[%s4004_s8 + $0x28] sm:$0xff]  ;;  %v1205_v21 = vld [vmem:[%s4004_s8] sm:$0xff]  ;;  %v1485_v0 = vld [vmem:[%s4006_s10 + $0x38] sm:$0xff] }
 0x20d   : > { %v1478_v43 = vld [vmem:[%s4006_s10] sm:$0xff]  ;;  %v1489_v15 = vld [vmem:[%s4006_s10 + $0x58] sm:$0xff] }
 0x20e   : > { %v1482_v18 = vld [vmem:[%s4006_s10 + $0x20] sm:$0xff]  ;;  %v1493_v35 = vld [vmem:[%s4006_s10 + $0x78] sm:$0xff] }
 0x20f   : > { %1181 = vperm.xlu0 %2785, %v1107_v56   ;;  %1161 = vperm.xlu1 %2786, %v1103_v37   ;;  %v1211_v56 = vld [vmem:[%s4004_s8 + $0x30] sm:$0xff]  ;;  %v1206_v37 = vld [vmem:[%s4004_s8 + $0x8] sm:$0xff]  ;;  %v1486_v14 = vld [vmem:[%s4006_s10 + $0x40] sm:$0xff] }
 0x210   : > { %v1490_v45 = vld [vmem:[%s4006_s10 + $0x60] sm:$0xff] }
 0x213   : > { %1166 = vperm.xlu0 %2785, %v1104_v25   ;;  %1151 = vperm.xlu1 %2786, %v1101_v58   ;;  %v1207_v25 = vld [vmem:[%s4004_s8 + $0x10] sm:$0xff] }
 0x214   : > { %v1480_v58 = vld [vmem:[%s4006_s10 + $0x10] sm:$0xff] }
 0x217   : > { %1156 = vperm.xlu0 %2785, %v1102_v59   ;;  %1141 = vperm.xlu1 %2786, %v1099_v46   ;;  %v1479_v59 = vld [vmem:[%s4006_s10 + $0x8] sm:$0xff]  ;;  %v1484_v46 = vld [vmem:[%s4006_s10 + $0x30] sm:$0xff] }
 0x21b   : > { %1146 = vperm.xlu0 %2785, %v1100_v27   ;;  %1131 = vperm.xlu1 %2786, %v1097_v50   ;;  %v1483_v27 = vld [vmem:[%s4006_s10 + $0x28] sm:$0xff]  ;;  %v1488_v50 = vld [vmem:[%s4006_s10 + $0x50] sm:$0xff] }
 0x21f   : > { %1136 = vperm.xlu0 %2785, %v1098_v12   ;;  %1121 = vperm.xlu1 %2786, %v1095_v1   ;;  %v1487_v12 = vld [vmem:[%s4006_s10 + $0x48] sm:$0xff]  ;;  %v1492_v1 = vld [vmem:[%s4006_s10 + $0x70] sm:$0xff] }
 0x223   : > { %1126 = vperm.xlu0 %2785, %v1096_v61   ;;  %1111 = vperm.xlu1 %2786, %v1093_v8   ;;  %v1491_v61 = vld [vmem:[%s4006_s10 + $0x68] sm:$0xff] }
 0x227   : > { %1116 = vperm.xlu0 %2785, %v1094_v5   ;;  %1293 = vperm.xlu1 %2786, %v1219_v10  }
 0x22b   : > { %1298 = vperm.xlu0 %2785, %v1220_v11   ;;  %1283 = vperm.xlu1 %2786, %v1217_v16  }
 0x22f   : > { %1288 = vperm.xlu0 %2785, %v1218_v62   ;;  %1273 = vperm.xlu1 %2786, %v1215_v20  }
 0x233   : > { %1278 = vperm.xlu0 %2785, %v1216_v28   ;;  %1263 = vperm.xlu1 %2786, %v1213_v32  }
 0x237   : > { %1268 = vperm.xlu0 %2785, %v1214_v19   ;;  %1253 = vperm.xlu1 %2786, %v1211_v56  }
 0x23b   : > { %1258 = vperm.xlu0 %2785, %v1212_v30   ;;  %1243 = vperm.xlu1 %2786, %v1209_v48  }
 0x23f   : > { %1248 = vperm.xlu0 %2785, %v1210_v47   ;;  %1233 = vperm.xlu1 %2786, %v1207_v25   ;;  %v1191_v25 = vld [vmem:[%s4003_s7 + $0x10] sm:$0xff] }
 0x243   : > { %1238 = vperm.xlu0 %2785, %v1208_v53   ;;  %1223 = vperm.xlu1 %2786, %v1205_v21   ;;  %v1190_v53 = vld [vmem:[%s4003_s7 + $0x8] sm:$0xff]  ;;  %v1193_v21 = vld [vmem:[%s4003_s7 + $0x20] sm:$0xff] }
 0x247   : > { %1228 = vperm.xlu0 %2785, %v1206_v37   ;;  %1501 = vperm.xlu1 %2786, %v1479_v59   ;;  %v1192_v37 = vld [vmem:[%s4003_s7 + $0x18] sm:$0xff]  ;;  %v1195_v59 = vld [vmem:[%s4003_s7 + $0x30] sm:$0xff] }
 0x24b   : > { %1496 = vperm.xlu0 %2785, %v1478_v43   ;;  %1511 = vperm.xlu1 %2786, %v1481_v60   ;;  %v1194_v43 = vld [vmem:[%s4003_s7 + $0x28] sm:$0xff]  ;;  %v1197_v60 = vld [vmem:[%s4003_s7 + $0x40] sm:$0xff] }
 0x24f   : > { %1506 = vperm.xlu0 %2785, %v1480_v58   ;;  %1521 = vperm.xlu1 %2786, %v1483_v27   ;;  %v1196_v58 = vld [vmem:[%s4003_s7 + $0x38] sm:$0xff]  ;;  %v1199_v27 = vld [vmem:[%s4003_s7 + $0x50] sm:$0xff] }
 0x253   : > { %1516 = vperm.xlu0 %2785, %v1482_v18   ;;  %1531 = vperm.xlu1 %2786, %v1485_v0   ;;  %v1198_v18 = vld [vmem:[%s4003_s7 + $0x48] sm:$0xff]  ;;  %v1201_v0 = vld [vmem:[%s4003_s7 + $0x60] sm:$0xff] }
 0x257   : > { %1526 = vperm.xlu0 %2785, %v1484_v46   ;;  %1541 = vperm.xlu1 %2786, %v1487_v12   ;;  %v1200_v46 = vld [vmem:[%s4003_s7 + $0x58] sm:$0xff]  ;;  %v1203_v12 = vld [vmem:[%s4003_s7 + $0x70] sm:$0xff] }
 0x25b   : > { %1536 = vperm.xlu0 %2785, %v1486_v14   ;;  %1551 = vperm.xlu1 %2786, %v1489_v15   ;;  %v1202_v14 = vld [vmem:[%s4003_s7 + $0x68] sm:$0xff]  ;;  %v1462_v15 = vld [vmem:[%s4005_s9] sm:$0xff] }
 0x25c   : > { %2607 = vmatprep.mubr.f32.mxu1 %v1462_v15 }
 0x25f   : > { %1546 = vperm.xlu0 %2785, %v1488_v50   ;;  %1561 = vperm.xlu1 %2786, %v1491_v61   ;;  %v1204_v50 = vld [vmem:[%s4003_s7 + $0x78] sm:$0xff] }
 0x263   : > { %1556 = vperm.xlu0 %2785, %v1490_v45   ;;  %1571 = vperm.xlu1 %2786, %v1493_v35  }
 0x267   : > { %1566 = vperm.xlu0 %2785, %v1492_v1  }
 0x282   : > { %v1177_v5 = vpop.permute.xlu1 %1176 }
 0x286   : > { %v1187_v23 = vpop.permute.xlu0 %1186  ;;  %v1172_v42 = vpop.permute.xlu1 %1171 }
 0x287   : > { %2519 = vmatprep.subr.mxu0 %v1187_v23 }
 0x288   : > { %2520 = vmatpush3.msra.mxu0 %v1187_v23 }
 0x28a   : > { %v1182_v8 = vpop.permute.xlu0 %1181  ;;  %v1162_v10 = vpop.permute.xlu1 %1161 }
 0x28b   : > { %2521 = vmatprep.subr.mxu0 %v1182_v8 }
 0x28c   : > { %2522 = vmatpush3.msra.mxu0 %v1182_v8 }
 0x28d   : > { %2523 = vmatprep.subr.mxu0 %v1177_v5 }
 0x28e   : > { %2524 = vmatpush3.msra.mxu0 %v1177_v5  ;;  %v1167_v11 = vpop.permute.xlu0 %1166  ;;  %v1152_v16 = vpop.permute.xlu1 %1151 }
 0x28f   : > { %2525 = vmatprep.subr.mxu0 %v1172_v42 }
 0x290   : > { %2526 = vmatpush3.msra.mxu0 %v1172_v42 }
 0x291   : > { %2527 = vmatprep.subr.mxu0 %v1167_v11 }
 0x292   : > { %2528 = vmatpush3.msra.mxu0 %v1167_v11  ;;  %v1157_v62 = vpop.permute.xlu0 %1156  ;;  %v1142_v20 = vpop.permute.xlu1 %1141 }
 0x293   : > { %2529 = vmatprep.subr.mxu0 %v1162_v10 }
 0x294   : > { %2530 = vmatpush3.msra.mxu0 %v1162_v10 }
 0x295   : > { %2531 = vmatprep.subr.mxu0 %v1157_v62 }
 0x296   : > { %2532 = vmatpush3.msra.mxu0 %v1157_v62  ;;  %v1147_v28 = vpop.permute.xlu0 %1146  ;;  %v1132_v32 = vpop.permute.xlu1 %1131 }
 0x297   : > { %2533 = vmatprep.subr.mxu0 %v1152_v16 }
 0x298   : > { %2534 = vmatpush3.msra.mxu0 %v1152_v16 }
 0x299   : > { %2535 = vmatprep.subr.mxu0 %v1147_v28 }
 0x29a   : > { %2536 = vmatpush3.msra.mxu0 %v1147_v28  ;;  %v1137_v19 = vpop.permute.xlu0 %1136  ;;  %v1122_v56 = vpop.permute.xlu1 %1121 }
 0x29b   : > { %2537 = vmatprep.subr.mxu0 %v1142_v20 }
 0x29c   : > { %2538 = vmatpush3.msra.mxu0 %v1142_v20 }
 0x29d   : > { %2539 = vmatprep.subr.mxu0 %v1137_v19 }
 0x29e   : > { %2540 = vmatpush3.msra.mxu0 %v1137_v19  ;;  %v1127_v30 = vpop.permute.xlu0 %1126  ;;  %v1112_v48 = vpop.permute.xlu1 %1111 }
 0x29f   : > { %2541 = vmatprep.subr.mxu0 %v1132_v32 }
 0x2a0   : > { %2542 = vmatpush3.msra.mxu0 %v1132_v32 }
 0x2a1   : > { %2543 = vmatprep.subr.mxu0 %v1127_v30 }
 0x2a2   : > { %2544 = vmatpush3.msra.mxu0 %v1127_v30  ;;  %v1117_v47 = vpop.permute.xlu0 %1116  ;;  %v1294_v11 = vpop.permute.xlu1 %1293 }
 0x2a3   : > { %2545 = vmatprep.subr.mxu0 %v1122_v56 }
 0x2a4   : > { %2546 = vmatpush3.msra.mxu0 %v1122_v56 }
 0x2a5   : > { %2547 = vmatprep.subr.mxu0 %v1117_v47 }
 0x2a6   : > { %2548 = vmatpush3.msra.mxu0 %v1117_v47  ;;  %v1299_v8 = vpop.permute.xlu0 %1298  ;;  %v1284_v20 = vpop.permute.xlu1 %1283 }
 0x2a7   : > { %2549 = vmatprep.subr.mxu0 %v1112_v48 }
 0x2a8   : > { %2550 = vmatpush3.msra.mxu0 %v1112_v48 }
 0x2a9   : > { %2552 = vmatmul.mubr.f32.vlgmr.msra.gmra.mxu0 %v1190_v53 }
 0x2aa   : > { %2554 = vmatprep.mubr.f32.mxu0 %v1191_v25  ;;  %v1289_v16 = vpop.permute.xlu0 %1288  ;;  %v1274_v47 = vpop.permute.xlu1 %1273 }
 0x2ad   : > { %2555 = vmatmul.mubr.f32.gmra.mxu0 %v1192_v37 }
 0x2ae   : > { %2557 = vmatprep.mubr.f32.mxu0 %v1193_v21  ;;  %v1279_v30 = vpop.permute.xlu0 %1278 }
 0x2b1   : > { %2558 = vmatmul.mubr.f32.gmra.mxu0 %v1194_v43 }
 0x2b2   : > { %2560 = vmatprep.mubr.f32.mxu0 %v1195_v59  ;;  %v1269_v37 = vpop.permute.xlu0 %1268 }
 0x2b5   : > { %2561 = vmatmul.mubr.f32.gmra.mxu0 %v1196_v58 }
 0x2b6   : > { %2563 = vmatprep.mubr.f32.mxu0 %v1197_v60  ;;  %v1264_v60 = vpop.permute.xlu1 %1263 }
 0x2b9   : > { %2564 = vmatmul.mubr.f32.gmra.mxu0 %v1198_v18 }
 0x2ba   : > { %2566 = vmatprep.mubr.f32.mxu0 %v1199_v27  ;;  %v1254_v15 = vpop.permute.xlu1 %1253 }
 0x2bd   : > { %2567 = vmatmul.mubr.f32.gmra.mxu0 %v1200_v46 }
 0x2be   : > { %2569 = vmatprep.mubr.f32.mxu0 %v1201_v0 }
 0x2c1   : > { %2570 = vmatmul.mubr.f32.gmra.mxu0 %v1202_v14  ;;  %v1259_v14 = vpop.permute.xlu0 %1258 }
 0x2c2   : > { %2572 = vmatprep.mubr.f32.mxu0 %v1203_v12 }
 0x2c5   : > { %2573 = vmatmul.mubr.f32.gmra.mxu0 %v1204_v50 }
 0x369   : > { %v3708_v45 = vpop.f32.mrf.mxu0 }
 0x36b   : > { %v3710_v61 = vpop.f32.mrf.mxu0 }
 0x36d   : > { %v3712_v1 = vpop.f32.mrf.mxu0 }
 0x36f   : > { %v3714_v35 = vpop.f32.mrf.mxu0 }
 0x371   : > { %v2559_v23 = vpop.f32.mrf.mxu0 }
 0x373   : > { %v1387_v5 = vpop.f32.mrf.mxu0 }
 0x375   : > { %v2562_v42 = vpop.f32.mrf.mxu0 }
 0x377   : > { %v1397_v10 = vpop.f32.mrf.mxu0 }
 0x379   : > { %v2565_v62 = vpop.f32.mrf.mxu0 }
 0x37b   : > { %v1407_v28 = vpop.f32.mrf.mxu0 }
 0x37d   : > { %v2568_v19 = vpop.f32.mrf.mxu0 }
 0x37e   : > { %v1423_v46 = vadd.f32 %v2568_v19, %v1279_v30  ;;  %v1244_v30 = vpop.permute.xlu1 %1243 }
 0x37f   : > { %v1417_v32 = vpop.f32.mrf.mxu0 }
 0x380   : > { %v1418_v12 = vadd.f32 %v1417_v32, %v1274_v47 }
 0x381   : > { %v2571_v56 = vpop.f32.mrf.mxu0 }
 0x382   : > { %v1433_v43 = vadd.f32 %v2571_v56, %v1289_v16  ;;  %v1456_v16 = vmax.f32 %v1418_v12, 0.0  ;;  %v1403_v56 = vadd.f32 %v2562_v42, %v1259_v14  ;;  %v1467_v14 = vld [vmem:[%s4005_s9 + $0x28] sm:$0xff]  ;;  %v1468_v12 = vld [vmem:[%s4005_s9 + $0x30] sm:$0xff] }
 0x383   : > { %v1427_v48 = vpop.f32.mrf.mxu0 }
 0x384   : > { %v1428_v18 = vadd.f32 %v1427_v48, %v1284_v20  ;;  %v1459_v0 = vmax.f32 %v1433_v43, 0.0  ;;  %v1249_v20 = vpop.permute.xlu0 %1248  ;;  %v1398_v48 = vadd.f32 %v1397_v10, %v1254_v15  ;;  %v1470_v15 = vld [vmem:[%s4005_s9 + $0x40] sm:$0xff] }
 0x385   : > { %v2574_v53 = vpop.f32.mrf.mxu0  ;;  %v1393_v47 = vadd.f32 %v2559_v23, %v1249_v20  ;;  %v1475_v20 = vld [vmem:[%s4005_s9 + $0x68] sm:$0xff] }
 0x386   : > { %v1443_v25 = vadd.f32 %v2574_v53, %v1299_v8  ;;  %v1458_v50 = vmax.f32 %v1428_v18, 0.0  ;;  %v1413_v8 = vadd.f32 %v2565_v62, %v1269_v37  ;;  %v1457_v53 = vmax.f32 %v1423_v46, 0.0 }
 0x387   : > { %v1437_v21 = vpop.f32.mrf.mxu0  ;;  %v1388_v37 = vadd.f32 %v1387_v5, %v1244_v30  ;;  %v1451_v43 = vmax.f32 %v1393_v47, 0.0 }
 0x388   : > { %v1461_v59 = vmax.f32 %v1443_v25, 0.0  ;;  %v1438_v58 = vadd.f32 %v1437_v21, %v1294_v11  ;;  %v1408_v11 = vadd.f32 %v1407_v28, %v1264_v60  ;;  %v1455_v19 = vmax.f32 %v1413_v8, 0.0  ;;  %v1239_v62 = vpop.permute.xlu0 %1238  ;;  %v1234_v21 = vpop.permute.xlu1 %1233  ;;  %v1471_v8 = vld [vmem:[%s4005_s9 + $0x48] sm:$0xff] }
 0x389   : > { %v1453_v25 = vmax.f32 %v1403_v56, 0.0  ;;  %v1452_v28 = vmax.f32 %v1398_v48, 0.0  ;;  %v1383_v42 = vadd.f32 %v3712_v1, %v1239_v62  ;;  %v1378_v10 = vadd.f32 %v3714_v35, %v1234_v21  ;;  %v1463_v35 = vld [vmem:[%s4005_s9 + $0x8] sm:$0xff]  ;;  %v1476_v56 = vld [vmem:[%s4005_s9 + $0x70] sm:$0xff] }
 0x38a   : > { %v1460_v27 = vmax.f32 %v1438_v58, 0.0  ;;  %2575 = vmatprep.subr.mxu1 %v1461_v59  ;;  %v1454_v32 = vmax.f32 %v1408_v11, 0.0  ;;  %v1473_v11 = vld [vmem:[%s4005_s9 + $0x58] sm:$0xff] }
 0x38b   : > { %2576 = vmatpush3.msra.mxu1 %v1461_v59  ;;  %v1450_v59 = vmax.f32 %v1388_v37, 0.0  ;;  %v1449_v60 = vmax.f32 %v1383_v42, 0.0 }
 0x38c   : > { %2577 = vmatprep.subr.mxu1 %v1460_v27  ;;  %v1229_v58 = vpop.permute.xlu0 %1228  ;;  %v1224_v5 = vpop.permute.xlu1 %1223 }
 0x38d   : > { %2578 = vmatpush3.msra.mxu1 %v1460_v27  ;;  %v1373_v23 = vadd.f32 %v3708_v45, %v1229_v58  ;;  %v1368_v18 = vadd.f32 %v3710_v61, %v1224_v5  ;;  %v1448_v27 = vmax.f32 %v1378_v10, 0.0  ;;  %v1464_v45 = vld [vmem:[%s4005_s9 + $0x10] sm:$0xff]  ;;  %v1465_v61 = vld [vmem:[%s4005_s9 + $0x18] sm:$0xff] }
 0x38e   : > { %2579 = vmatprep.subr.mxu1 %v1459_v0 }
 0x38f   : > { %2580 = vmatpush3.msra.mxu1 %v1459_v0  ;;  %v1447_v1 = vmax.f32 %v1373_v23, 0.0  ;;  %v1446_v46 = vmax.f32 %v1368_v18, 0.0  ;;  %v1466_v0 = vld [vmem:[%s4005_s9 + $0x20] sm:$0xff] }
 0x390   : > { %2581 = vmatprep.subr.mxu1 %v1458_v50  ;;  %v1502_v30 = vpop.permute.xlu1 %1501  ;;  %v1497_v48 = vpop.permute.xlu0 %1496 }
 0x391   : > { %2582 = vmatpush3.msra.mxu1 %v1458_v50  ;;  %v1469_v50 = vld [vmem:[%s4005_s9 + $0x38] sm:$0xff] }
 0x392   : > { %2583 = vmatprep.subr.mxu1 %v1457_v53 }
 0x393   : > { %2584 = vmatpush3.msra.mxu1 %v1457_v53  ;;  %v1472_v53 = vld [vmem:[%s4005_s9 + $0x50] sm:$0xff] }
 0x394   : > { %2585 = vmatprep.subr.mxu1 %v1456_v16  ;;  %v1507_v47 = vpop.permute.xlu0 %1506 }
 0x395   : > { %2586 = vmatpush3.msra.mxu1 %v1456_v16  ;;  %v1474_v16 = vld [vmem:[%s4005_s9 + $0x60] sm:$0xff] }
 0x396   : > { %2587 = vmatprep.subr.mxu1 %v1455_v19 }
 0x397   : > { %2588 = vmatpush3.msra.mxu1 %v1455_v19  ;;  %v1477_v19 = vld [vmem:[%s4005_s9 + $0x78] sm:$0xff] }
 0x398   : > { %2589 = vmatprep.subr.mxu1 %v1454_v32  ;;  %v1517_v62 = vpop.permute.xlu0 %1516 }
 0x399   : > { %2590 = vmatpush3.msra.mxu1 %v1454_v32  ;;  %v1512_v32 = vpop.permute.xlu1 %1511 }
 0x39a   : > { %2591 = vmatprep.subr.mxu1 %v1453_v25 }
 0x39b   : > { %2592 = vmatpush3.msra.mxu1 %v1453_v25 }
 0x39c   : > { %2593 = vmatprep.subr.mxu1 %v1452_v28 }
 0x39d   : > { %2594 = vmatpush3.msra.mxu1 %v1452_v28  ;;  %v1522_v25 = vpop.permute.xlu1 %1521 }
 0x39e   : > { %2595 = vmatprep.subr.mxu1 %v1451_v43 }
 0x39f   : > { %2596 = vmatpush3.msra.mxu1 %v1451_v43 }
 0x3a0   : > { %2597 = vmatprep.subr.mxu1 %v1450_v59 }
 0x3a1   : > { %2598 = vmatpush3.msra.mxu1 %v1450_v59  ;;  %v1532_v10 = vpop.permute.xlu1 %1531 }
 0x3a2   : > { %2599 = vmatprep.subr.mxu1 %v1449_v60 }
 0x3a3   : > { %2600 = vmatpush3.msra.mxu1 %v1449_v60  ;;  %v1527_v60 = vpop.permute.xlu0 %1526 }
 0x3a4   : > { %2601 = vmatprep.subr.mxu1 %v1448_v27 }
 0x3a5   : > { %2602 = vmatpush3.msra.mxu1 %v1448_v27 }
 0x3a6   : > { %2603 = vmatprep.subr.mxu1 %v1447_v1 }
 0x3a7   : > { %2604 = vmatpush3.msra.mxu1 %v1447_v1 }
 0x3a8   : > { %2605 = vmatprep.subr.mxu1 %v1446_v46 }
 0x3a9   : > { %2606 = vmatpush3.msra.mxu1 %v1446_v46 }
 0x3aa   : > { %2608 = vmatmul.mubr.f32.vlgmr.msra.gmra.mxu1 %v1463_v35 }
 0x3ab   : > { %2610 = vmatprep.mubr.f32.mxu1 %v1464_v45  ;;  %v1542_v45 = vpop.permute.xlu1 %1541 }
 0x3ae   : > { %2611 = vmatmul.mubr.f32.gmra.mxu1 %v1465_v61 }
 0x3af   : > { %2613 = vmatprep.mubr.f32.mxu1 %v1466_v0 }
 0x3b2   : > { %2614 = vmatmul.mubr.f32.gmra.mxu1 %v1467_v14 }
 0x3b3   : > { %2616 = vmatprep.mubr.f32.mxu1 %v1468_v12  ;;  %v1537_v12 = vpop.permute.xlu0 %1536 }
 0x3b6   : > { %2617 = vmatmul.mubr.f32.gmra.mxu1 %v1469_v50 }
 0x3b7   : > { %2619 = vmatprep.mubr.f32.mxu1 %v1470_v15 }
 0x3ba   : > { %2620 = vmatmul.mubr.f32.gmra.mxu1 %v1471_v8 }
 0x3bb   : > { %2622 = vmatprep.mubr.f32.mxu1 %v1472_v53 }
 0x3be   : > { %2623 = vmatmul.mubr.f32.gmra.mxu1 %v1473_v11 }
 0x3bf   : > { %2625 = vmatprep.mubr.f32.mxu1 %v1474_v16 }
 0x3c2   : > { %2626 = vmatmul.mubr.f32.gmra.mxu1 %v1475_v20  ;;  %v1552_v20 = vpop.permute.xlu1 %1551 }
 0x3c3   : > { %2628 = vmatprep.mubr.f32.mxu1 %v1476_v56 }
 0x3c6   : > { %2629 = vmatmul.mubr.f32.gmra.mxu1 %v1477_v19 }
 0x46a   : > { %v2609_v37 = vpop.f32.mrf.mxu1 }
 0x46b   : > { %v1646_v28 = vadd.f32 %v2609_v37, %v1502_v30 }
 0x46c   : > { %v1640_v21 = vpop.f32.mrf.mxu1 }
 0x46d   : > { %v2409_v42 = vmul.f32 -1.442695, %v1646_v28  ;;  %v1641_v43 = vadd.f32 %v1640_v21, %v1497_v48 }
 0x46e   : > { %v2612_v59 = vpop.f32.mrf.mxu1 }
 0x46f   : > { %2787 = vpow2.f32 %v2409_v42  ;;  %v2408_v58 = vmul.f32 -1.442695, %v1641_v43  ;;  %v1656_v23 = vadd.f32 %v2612_v59, %v1512_v32  ;;  %v1547_v32 = vpop.permute.xlu0 %1546 }
 0x470   : > { %v1650_v5 = vpop.f32.mrf.mxu1 }
 0x471   : > { %2789 = vpow2.f32 %v2408_v58  ;;  %v2411_v18 = vmul.f32 -1.442695, %v1656_v23  ;;  %v1651_v27 = vadd.f32 %v1650_v5, %v1507_v47  ;;  %v1562_v58 = vpop.permute.xlu1 %1561 }
 0x472   : > { %v2615_v1 = vpop.f32.mrf.mxu1 }
 0x473   : > { %2791 = vpow2.f32 %v2411_v18  ;;  %v2410_v46 = vmul.f32 -1.442695, %v1651_v27  ;;  %v1666_v35 = vadd.f32 %v2615_v1, %v1522_v25  ;;  %v1557_v1 = vpop.permute.xlu0 %1556 }
 0x474   : > { %v1660_v61 = vpop.f32.mrf.mxu1 }
 0x475   : > { %2793 = vpow2.f32 %v2410_v46  ;;  %v2413_v0 = vmul.f32 -1.442695, %v1666_v35  ;;  %v1661_v14 = vadd.f32 %v1660_v61, %v1517_v62 }
 0x476   : > { %v2618_v50 = vpop.f32.mrf.mxu1 }
 0x477   : > { %2795 = vpow2.f32 %v2413_v0  ;;  %v2412_v15 = vmul.f32 -1.442695, %v1661_v14  ;;  %v1676_v8 = vadd.f32 %v2618_v50, %v1532_v10 }
 0x478   : > { %v1670_v53 = vpop.f32.mrf.mxu1 }
 0x479   : > { %2797 = vpow2.f32 %v2412_v15  ;;  %v2415_v11 = vmul.f32 -1.442695, %v1676_v8  ;;  %v1671_v16 = vadd.f32 %v1670_v53, %v1527_v60  ;;  %v1572_v53 = vpop.permute.xlu1 %1571 }
 0x47a   : > { %v2621_v56 = vpop.f32.mrf.mxu1 }
 0x47b   : > { %2799 = vpow2.f32 %v2415_v11  ;;  %v2414_v19 = vmul.f32 -1.442695, %v1671_v16  ;;  %v1686_v30 = vadd.f32 %v2621_v56, %v1542_v45 }
 0x47c   : > { %v2788_v48 = vpop.eup %2787  ;;  %v1680_v47 = vpop.f32.mrf.mxu1 }
 0x47d   : > { %v1768_v25 = vadd.f32 1.0, %v2788_v48  ;;  %2801 = vpow2.f32 %v2414_v19  ;;  %v2417_v62 = vmul.f32 -1.442695, %v1686_v30  ;;  %v1681_v37 = vadd.f32 %v1680_v47, %v1537_v12  ;;  %v1567_v30 = vpop.permute.xlu0 %1566 }
 0x47e   : > { %v2790_v28 = vpop.eup %2789  ;;  %v2624_v21 = vpop.f32.mrf.mxu1 }
 0x47f   : > { %2803 = vrcp.f32 %v1768_v25  ;;  %v1767_v42 = vadd.f32 1.0, %v2790_v28  ;;  %v2416_v43 = vmul.f32 -1.442695, %v1681_v37  ;;  %v1696_v10 = vadd.f32 %v2624_v21, %v1552_v20 }
 0x480   : > { %v2792_v59 = vpop.eup %2791  ;;  %2805 = vpow2.f32 %v2417_v62  ;;  %v1690_v23 = vpop.f32.mrf.mxu1 }
 0x481   : > { %2807 = vrcp.f32 %v1767_v42  ;;  %v1770_v60 = vadd.f32 1.0, %v2792_v59  ;;  %v2419_v5 = vmul.f32 -1.442695, %v1696_v10  ;;  %v1691_v18 = vadd.f32 %v1690_v23, %v1547_v32 }
 0x482   : > { %v2794_v27 = vpop.eup %2793  ;;  %2809 = vpow2.f32 %v2416_v43  ;;  %v2627_v46 = vpop.f32.mrf.mxu1 }
 0x483   : > { %2811 = vrcp.f32 %v1770_v60  ;;  %v1769_v35 = vadd.f32 1.0, %v2794_v27  ;;  %v2418_v45 = vmul.f32 -1.442695, %v1691_v18  ;;  %v1706_v61 = vadd.f32 %v2627_v46, %v1562_v58 }
 0x484   : > { %v2796_v0 = vpop.eup %2795  ;;  %2813 = vpow2.f32 %v2419_v5  ;;  %v1700_v14 = vpop.f32.mrf.mxu1 }
 0x485   : > { %2815 = vrcp.f32 %v1769_v35  ;;  %v1772_v12 = vadd.f32 1.0, %v2796_v0  ;;  %v2421_v50 = vmul.f32 -1.442695, %v1706_v61  ;;  %v1701_v15 = vadd.f32 %v1700_v14, %v1557_v1 }
 0x486   : > { %v2798_v8 = vpop.eup %2797  ;;  %2817 = vpow2.f32 %v2418_v45  ;;  %v2630_v11 = vpop.f32.mrf.mxu1 }
 0x487   : > { %2819 = vrcp.f32 %v1772_v12  ;;  %v1771_v16 = vadd.f32 1.0, %v2798_v8  ;;  %v2420_v20 = vmul.f32 -1.442695, %v1701_v15  ;;  %v1716_v56 = vadd.f32 %v2630_v11, %v1572_v53 }
 0x488   : > { %v2800_v19 = vpop.eup %2799  ;;  %2821 = vpow2.f32 %v2421_v50  ;;  %v1710_v48 = vpop.f32.mrf.mxu1 }
 0x489   : > { %2823 = vrcp.f32 %v1771_v16  ;;  %v1774_v32 = vadd.f32 1.0, %v2800_v19  ;;  %v2423_v47 = vmul.f32 -1.442695, %v1716_v56  ;;  %v1711_v25 = vadd.f32 %v1710_v48, %v1567_v30 }
 0x48a   : > { %v2802_v62 = vpop.eup %2801  ;;  %2825 = vpow2.f32 %v2420_v20 }
 0x48b   : > { %2827 = vrcp.f32 %v1774_v32  ;;  %v1773_v37 = vadd.f32 1.0, %v2802_v62  ;;  %v2422_v28 = vmul.f32 -1.442695, %v1711_v25 }
 0x48c   : > { %v2804_v21 = vpop.eup %2803  ;;  %2829 = vpow2.f32 %v2423_v47 }
 0x48d   : > { %v2806_v42 = vpop.eup %2805  ;;  %1816 = vst.msk [vmem:[#allocation3 + $0x8] sm:$0xff] %vm1056_vm1, %v2804_v21  ;;  %2831 = vrcp.f32 %v1773_v37 }
 0x48e   : > { %v2808_v43 = vpop.eup %2807  ;;  %v1776_v10 = vadd.f32 1.0, %v2806_v42  ;;  %2833 = vpow2.f32 %v2422_v28 }
 0x48f   : > { %v2810_v59 = vpop.eup %2809  ;;  %1815 = vst.msk [vmem:[#allocation3] sm:$0xff] %vm1056_vm1, %v2808_v43 }
 0x490   : > { %v2812_v58 = vpop.eup %2811  ;;  %2835 = vrcp.f32 %v1776_v10  ;;  %v1775_v23 = vadd.f32 1.0, %v2810_v59 }
 0x491   : > { %v2814_v60 = vpop.eup %2813  ;;  %1818 = vst.msk [vmem:[#allocation3 + $0x18] sm:$0xff] %vm1056_vm1, %v2812_v58 }
 0x492   : > { %v2816_v5 = vpop.eup %2815  ;;  %2837 = vrcp.f32 %v1775_v23  ;;  %v1778_v18 = vadd.f32 1.0, %v2814_v60 }
 0x493   : > { %v2818_v27 = vpop.eup %2817  ;;  %1817 = vst.msk [vmem:[#allocation3 + $0x10] sm:$0xff] %vm1056_vm1, %v2816_v5 }
 0x494   : > { %v2820_v1 = vpop.eup %2819  ;;  %2839 = vrcp.f32 %v1778_v18  ;;  %v1777_v46 = vadd.f32 1.0, %v2818_v27 }
 0x495   : > { %v2822_v35 = vpop.eup %2821 }
 0x496   : > { %v2824_v45 = vpop.eup %2823  ;;  %2841 = vrcp.f32 %v1777_v46  ;;  %v1780_v61 = vadd.f32 1.0, %v2822_v35 }
 0x497   : > { %v2826_v0 = vpop.eup %2825 }
 0x498   : > { %v2828_v14 = vpop.eup %2827  ;;  %2843 = vrcp.f32 %v1780_v61  ;;  %v1779_v12 = vadd.f32 1.0, %v2826_v0 }
 0x499   : > { %v2830_v50 = vpop.eup %2829 }
 0x49a   : > { %v2832_v15 = vpop.eup %2831  ;;  %2845 = vrcp.f32 %v1779_v12  ;;  %v1782_v8 = vadd.f32 1.0, %v2830_v50 }
 0x49b   : > { %v2834_v53 = vpop.eup %2833 }
 0x49c   : > { %2847 = vrcp.f32 %v1782_v8  ;;  %v1781_v11 = vadd.f32 1.0, %v2834_v53 }
 0x49d   : > { %v2836_v16 = vpop.eup %2835 }
 0x49e   : > { %2849 = vrcp.f32 %v1781_v11 }
 0x49f   : > { %v2838_v20 = vpop.eup %2837 }
 0x4a1   : > { %v2840_v56 = vpop.eup %2839 }
 0x4a3   : > { %v2842_v19 = vpop.eup %2841 }
 0x4a5   : > { %v2844_v30 = vpop.eup %2843 }
 0x4a7   : > { %v2846_v48 = vpop.eup %2845 }
 0x4a9   : > { %v2848_v32 = vpop.eup %2847 }
 0x4ab   : > { %v2850_v47 = vpop.eup %2849 }
 0x4ac PF: > { %p2424_p4 = scmp.ne.s32.totalorder %s2953_s23, 1 }
 0x4ad   : > { %s2249_s0 = sld [smem:[#allocation4]] (!%p2424_p4) }
 0x4ae   : > { %1834 = sbr.rel (%p2424_p4) target bundleno = 1524 (0x5f4), region = 80 }
 0x4b3   : > { %v1858_v25 = vpack.c.bf16 %v966_v41, %v965_v57  ;;  %v1857_v62 = vpack.c.bf16 %v964_v39, %v963_v63  ;;  %v2981_v37 = vmov 0   ;;  %v1859_v28 = vld [vmem:[%s4000_s4] sm:$0xff]  ;;  %v1861_v54 = vld [vmem:[%s4000_s4 + $0x10] sm:$0xff]  ;;  %v1856_v34 = vpack.c.bf16 %v962_v40, %v961_v52  ;;  %v1860_v63 = vld [vmem:[%s4000_s4 + $0x8] sm:$0xff] }
 0x4b4   : > { %2851 = vset.pattern.permute.xlu0 %v2981_v37  ;;  %2852 = vset.pattern.permute.xlu1 %v2981_v37  ;;  %v2853_v57 = vld [vmem:[%s3999_s3] sm:$0xff]   ;;  %v1862_v51 = vld [vmem:[%s4000_s4 + $0x18] sm:$0xff]  ;;  %v1855_v52 = vpack.c.bf16 %v960_v36, %v959_v49  ;;  %v2117_v40 = vld [vmem:[%s4001_s5 + $0x8] sm:$0xff]  ;;  %v1854_v24 = vpack.c.bf16 %v958_v26, %v957_v2  ;;  %v1853_v4 = vpack.c.bf16 %v956_v33, %v955_v38 }
 0x4b5   : > { %2631 = vmatprep.subr.bf16.mxu0 %v1858_v25  ;;  %2663 = vmatprep.subr.bf16.mxu1 %v1858_v25  ;;  %v2854_v22 = vld [vmem:[%s3999_s3 + $0x20] sm:$0xff]   ;;  %v2118_v3 = vld [vmem:[%s4001_s5 + $0x10] sm:$0xff]  ;;  %v1864_v2 = vld [vmem:[%s4000_s4 + $0x28] sm:$0xff]  ;;  %v1852_v29 = vpack.c.bf16 %v3457_v31, %v3450_v6  ;;  %v1851_v33 = vpack.c.bf16 %v3431_v13, %v3443_v17 }
 0x4b6   : > { %2632 = vmatpush3.bf16.msra.mxu0 %v1858_v25  ;;  %2671 = vmatpush3.bf16.msra.mxu1 %v1858_v25  ;;  %v2116_v9 = vld [vmem:[%s4001_s5] sm:$0xff]  ;;  %v2119_v55 = vld [vmem:[%s4001_s5 + $0x18] sm:$0xff]  ;;  %v1865_v38 = vld [vmem:[%s4000_s4 + $0x30] sm:$0xff] }
 0x4b7   : > { %2633 = vmatprep.subr.bf16.mxu0 %v1857_v62  ;;  %2664 = vmatprep.subr.bf16.mxu1 %v1857_v62  ;;  %v1863_v49 = vld [vmem:[%s4000_s4 + $0x20] sm:$0xff]  ;;  %v1866_v26 = vld [vmem:[%s4000_s4 + $0x38] sm:$0xff]  ;;  %v2121_v36 = vld [vmem:[%s4001_s5 + $0x28] sm:$0xff] }
 0x4b8   : > { %1877 = vperm.xlu0 %2851, %v1859_v28   ;;  %1887 = vperm.xlu1 %2852, %v1861_v54   ;;  %v2120_v44 = vld [vmem:[%s4001_s5 + $0x20] sm:$0xff]  ;;  %v2855_v39 = vld [vmem:[%s3999_s3 + $0x8] sm:$0xff]   ;;  %v2122_v21 = vld [vmem:[%s4001_s5 + $0x30] sm:$0xff] }
 0x4b9   : > { %2647 = vmatprep.mubr.bf16.mxu0 %v2853_v57  ;;  %2655 = vmatprep.mubr.bf16.mxu1 %v2854_v22  ;;  %v2856_v7 = vld [vmem:[%s3999_s3 + $0x28] sm:$0xff]   ;;  %v1867_v41 = vld [vmem:[%s4000_s4 + $0x40] sm:$0xff]  ;;  %v2857_v42 = vld [vmem:[%s3999_s3 + $0x10] sm:$0xff]  }
 0x4ba   : > { %2634 = vmatpush3.bf16.msra.mxu0 %v1857_v62  ;;  %2672 = vmatpush3.bf16.msra.mxu1 %v1857_v62  ;;  %v2858_v43 = vld [vmem:[%s3999_s3 + $0x30] sm:$0xff]   ;;  %v1868_v10 = vld [vmem:[%s4000_s4 + $0x48] sm:$0xff]  ;;  %v2123_v59 = vld [vmem:[%s4001_s5 + $0x38] sm:$0xff] }
 0x4bb   : > { %2635 = vmatprep.subr.bf16.mxu0 %v1856_v34  ;;  %2665 = vmatprep.subr.bf16.mxu1 %v1856_v34  ;;  %v2859_v58 = vld [vmem:[%s3999_s3 + $0x18] sm:$0xff]   ;;  %v1869_v60 = vld [vmem:[%s4000_s4 + $0x50] sm:$0xff]  ;;  %v2124_v5 = vld [vmem:[%s4001_s5 + $0x40] sm:$0xff] }
 0x4bc   : > { %1882 = vperm.xlu0 %2851, %v1860_v63   ;;  %1892 = vperm.xlu1 %2852, %v1862_v51   ;;  %v2860_v23 = vld [vmem:[%s3999_s3 + $0x38] sm:$0xff]   ;;  %v2125_v27 = vld [vmem:[%s4001_s5 + $0x48] sm:$0xff]  ;;  %v1871_v1 = vld [vmem:[%s4000_s4 + $0x60] sm:$0xff] }
 0x4bd   : > { %v1870_v18 = vld [vmem:[%s4000_s4 + $0x58] sm:$0xff]  ;;  %v2126_v46 = vld [vmem:[%s4001_s5 + $0x50] sm:$0xff]  ;;  %v1872_v35 = vld [vmem:[%s4000_s4 + $0x68] sm:$0xff] }
 0x4be   : > { %2636 = vmatpush3.bf16.msra.mxu0 %v1856_v34  ;;  %2673 = vmatpush3.bf16.msra.mxu1 %v1856_v34  ;;  %v2127_v45 = vld [vmem:[%s4001_s5 + $0x58] sm:$0xff]  ;;  %v1873_v61 = vld [vmem:[%s4000_s4 + $0x70] sm:$0xff]  ;;  %v2128_v0 = vld [vmem:[%s4001_s5 + $0x60] sm:$0xff] }
 0x4bf   : > { %2637 = vmatprep.subr.bf16.mxu0 %v1855_v52  ;;  %2666 = vmatprep.subr.bf16.mxu1 %v1855_v52  ;;  %v1874_v14 = vld [vmem:[%s4000_s4 + $0x78] sm:$0xff]  ;;  %v2129_v12 = vld [vmem:[%s4001_s5 + $0x68] sm:$0xff]  ;;  %v2130_v50 = vld [vmem:[%s4001_s5 + $0x70] sm:$0xff] }
 0x4c0   : > { %2134 = vperm.xlu0 %2851, %v2116_v9   ;;  %2139 = vperm.xlu1 %2852, %v2117_v40   ;;  %v2131_v15 = vld [vmem:[%s4001_s5 + $0x78] sm:$0xff]  ;;  %v2258_v8 = vld [vmem:[#allocation3] sm:$0xff]  ;;  %v2259_v53 = vld [vmem:[#allocation3 + $0x8] sm:$0xff] }
 0x4c1   : > { %v2260_v11 = vld [vmem:[#allocation3 + $0x10] sm:$0xff]  ;;  %v2261_v16 = vld [vmem:[#allocation3 + $0x18] sm:$0xff] }
 0x4c2   : > { %2638 = vmatpush3.bf16.msra.mxu0 %v1855_v52  ;;  %2674 = vmatpush3.bf16.msra.mxu1 %v1855_v52 }
 0x4c3   : > { %2639 = vmatprep.subr.bf16.mxu0 %v1854_v24  ;;  %2667 = vmatprep.subr.bf16.mxu1 %v1854_v24 }
 0x4c4   : > { %1897 = vperm.xlu0 %2851, %v1863_v49   ;;  %2144 = vperm.xlu1 %2852, %v2118_v3  }
 0x4c6   : > { %2640 = vmatpush3.bf16.msra.mxu0 %v1854_v24  ;;  %2675 = vmatpush3.bf16.msra.mxu1 %v1854_v24 }
 0x4c7   : > { %2641 = vmatprep.subr.bf16.mxu0 %v1853_v4  ;;  %2668 = vmatprep.subr.bf16.mxu1 %v1853_v4 }
 0x4c8   : > { %1902 = vperm.xlu0 %2851, %v1864_v2   ;;  %2149 = vperm.xlu1 %2852, %v2119_v55  }
 0x4ca   : > { %2642 = vmatpush3.bf16.msra.mxu0 %v1853_v4  ;;  %2676 = vmatpush3.bf16.msra.mxu1 %v1853_v4 }
 0x4cb   : > { %2643 = vmatprep.subr.bf16.mxu0 %v1852_v29  ;;  %2669 = vmatprep.subr.bf16.mxu1 %v1852_v29 }
 0x4cc   : > { %1907 = vperm.xlu0 %2851, %v1865_v38   ;;  %2154 = vperm.xlu1 %2852, %v2120_v44  }
 0x4ce   : > { %2644 = vmatpush3.bf16.msra.mxu0 %v1852_v29  ;;  %2677 = vmatpush3.bf16.msra.mxu1 %v1852_v29 }
 0x4cf   : > { %2645 = vmatprep.subr.bf16.mxu0 %v1851_v33  ;;  %2670 = vmatprep.subr.bf16.mxu1 %v1851_v33 }
 0x4d0   : > { %1912 = vperm.xlu0 %2851, %v1866_v26   ;;  %2159 = vperm.xlu1 %2852, %v2121_v36  }
 0x4d2   : > { %2646 = vmatpush3.bf16.msra.mxu0 %v1851_v33  ;;  %2678 = vmatpush3.bf16.msra.mxu1 %v1851_v33 }
 0x4d4   : > { %1917 = vperm.xlu0 %2851, %v1867_v41   ;;  %2164 = vperm.xlu1 %2852, %v2122_v21  }
 0x4d5   : > { %2648 = vmatmul.mubr.bf16.vlgmr.msra.gmra.mxu0 %v2855_v39  ;;  %2656 = vmatmul.mubr.bf16.vlgmr.msra.gmra.mxu1 %v2856_v7 }
 0x4d6   : > { %2651 = vmatprep.mubr.bf16.mxu0 %v2857_v42  ;;  %2659 = vmatprep.mubr.bf16.mxu1 %v2858_v43 }
 0x4d8   : > { %1922 = vperm.xlu0 %2851, %v1868_v10   ;;  %2169 = vperm.xlu1 %2852, %v2123_v59  }
 0x4dc   : > { %1927 = vperm.xlu0 %2851, %v1869_v60   ;;  %2174 = vperm.xlu1 %2852, %v2124_v5  }
 0x4dd   : > { %2652 = vmatmul.mubr.bf16.gmra.mxu0 %v2859_v58  ;;  %2660 = vmatmul.mubr.bf16.gmra.mxu1 %v2860_v23 }
 0x4e0   : > { %1932 = vperm.xlu0 %2851, %v1870_v18   ;;  %2179 = vperm.xlu1 %2852, %v2125_v27  }
 0x4e4   : > { %1937 = vperm.xlu0 %2851, %v1871_v1   ;;  %2184 = vperm.xlu1 %2852, %v2126_v46  }
 0x4e8   : > { %1942 = vperm.xlu0 %2851, %v1872_v35   ;;  %2189 = vperm.xlu1 %2852, %v2127_v45  }
 0x4ec   : > { %1947 = vperm.xlu0 %2851, %v1873_v61   ;;  %2194 = vperm.xlu1 %2852, %v2128_v0  }
 0x4f0   : > { %1952 = vperm.xlu0 %2851, %v1874_v14   ;;  %2199 = vperm.xlu1 %2852, %v2129_v12  }
 0x4f4   : > { %2204 = vperm.xlu0 %2851, %v2130_v50   ;;  %2209 = vperm.xlu1 %2852, %v2131_v15  }
 0x4f8   : > { %2264 = vperm.xlu0 %2851, %v2258_v8   ;;  %2269 = vperm.xlu1 %2852, %v2259_v53  }
 0x4fc   : > { %2274 = vperm.xlu0 %2851, %v2260_v11   ;;  %2279 = vperm.xlu1 %2852, %v2261_v16  }
 0x533   : > { %v1878_v20 = vpop.permute.xlu0 %1877  ;;  %v1888_v56 = vpop.permute.xlu1 %1887 }
 0x537   : > { %v1883_v19 = vpop.permute.xlu0 %1882  ;;  %v1893_v30 = vpop.permute.xlu1 %1892 }
 0x53b   : > { %v2135_v48 = vpop.permute.xlu0 %2134  ;;  %v2140_v32 = vpop.permute.xlu1 %2139 }
 0x53f   : > { %v1898_v47 = vpop.permute.xlu0 %1897  ;;  %v2145_v25 = vpop.permute.xlu1 %2144 }
 0x543   : > { %v1903_v62 = vpop.permute.xlu0 %1902  ;;  %v2150_v37 = vpop.permute.xlu1 %2149 }
 0x547   : > { %v1908_v28 = vpop.permute.xlu0 %1907  ;;  %v2155_v54 = vpop.permute.xlu1 %2154 }
 0x54b   : > { %v1913_v34 = vpop.permute.xlu0 %1912  ;;  %v2160_v63 = vpop.permute.xlu1 %2159 }
 0x54f   : > { %v1918_v57 = vpop.permute.xlu0 %1917  ;;  %v2165_v51 = vpop.permute.xlu1 %2164 }
 0x553   : > { %v1923_v22 = vpop.permute.xlu0 %1922  ;;  %v2170_v52 = vpop.permute.xlu1 %2169 }
 0x557   : > { %v1928_v9 = vpop.permute.xlu0 %1927  ;;  %v2175_v49 = vpop.permute.xlu1 %2174 }
 0x55b   : > { %v1933_v38 = vpop.permute.xlu0 %1932  ;;  %v2180_v26 = vpop.permute.xlu1 %2179 }
 0x55f   : > { %v1938_v59 = vpop.permute.xlu0 %1937  ;;  %v2185_v45 = vpop.permute.xlu1 %2184 }
 0x595   : > { %v2649_v40 = vpop.f32.mrf.mxu0  ;;  %v2657_v24 = vpop.f32.mrf.mxu1 }
 0x596   : > { %v2046_v44 = vadd.f32 %v2649_v40, %v1888_v56  ;;  %v2078_v40 = vadd.f32 %v2657_v24, %v1928_v9 }
 0x597   : > { %v2037_v3 = vpop.f32.mrf.mxu0  ;;  %v2069_v4 = vpop.f32.mrf.mxu1 }
 0x598   : > { %v2038_v2 = vadd.f32 %v2037_v3, %v1878_v20  ;;  %v2102_v42 = vmax.f32 %v2046_v44, 0.0  ;;  %v2070_v8 = vadd.f32 %v2069_v4, %v1918_v57 }
 0x599   : > { %v2650_v55 = vpop.f32.mrf.mxu0  ;;  %v2658_v29 = vpop.f32.mrf.mxu1 }
 0x59a   : > { %v2100_v36 = vmax.f32 %v2038_v2, 0.0  ;;  %v2049_v39 = vadd.f32 %v2650_v55, %v1893_v30  ;;  %v2214_v1 = vmul.f32 %v2145_v25, %v2102_v42  ;;  %v2190_v25 = vpop.permute.xlu1 %2189  ;;  %v2108_v3 = vmax.f32 %v2070_v8, 0.0 }
 0x59b   : > { %v2040_v33 = vpop.f32.mrf.mxu0  ;;  %v2072_v41 = vpop.f32.mrf.mxu1  ;;  %v2081_v55 = vadd.f32 %v2658_v29, %v1933_v38  ;;  %v2250_v8 = vstv %s2249_s0 }
 0x59c   : > { %v2041_v7 = vadd.f32 %v2040_v33, %v1883_v19  ;;  %v2212_v58 = vmul.f32 %v2135_v48, %v2100_v36  ;;  %v2103_v23 = vmax.f32 %v2049_v39, 0.0  ;;  %v1943_v19 = vpop.permute.xlu0 %1942  ;;  %v2073_v30 = vadd.f32 %v2072_v41, %v1923_v22 }
 0x59d   : > { %v2653_v21 = vpop.f32.mrf.mxu0  ;;  %v2661_v5 = vpop.f32.mrf.mxu1  ;;  %v2220_v33 = vmul.f32 %v2175_v49, %v2108_v3 }
 0x59e   : > { %v2101_v43 = vmax.f32 %v2041_v7, 0.0  ;;  %v2062_v35 = vadd.f32 %v2653_v21, %v1908_v28  ;;  %v2215_v14 = vmul.f32 %v2150_v37, %v2103_v23  ;;  %v2195_v22 = vpop.permute.xlu1 %2194  ;;  %v2111_v7 = vmax.f32 %v2081_v55, 0.0 }
 0x59f   : > { %v2053_v10 = vpop.f32.mrf.mxu0  ;;  %v2085_v53 = vpop.f32.mrf.mxu1 }
 0x5a0   : > { %v2213_v60 = vmul.f32 %v2140_v32, %v2101_v43  ;;  %v2054_v18 = vadd.f32 %v2053_v10, %v1898_v47  ;;  %v2106_v11 = vmax.f32 %v2062_v35, 0.0  ;;  %v1948_v4 = vpop.permute.xlu0 %1947  ;;  %v2086_v36 = vadd.f32 %v2085_v53, %v1938_v59 }
 0x5a1   : > { %v2654_v27 = vpop.f32.mrf.mxu0  ;;  %v2662_v28 = vpop.f32.mrf.mxu1  ;;  %v2094_v9 = vadd.f32 %v2661_v5, %v1948_v4  ;;  %v2223_v29 = vmul.f32 %v2190_v25, %v2111_v7 }
 0x5a2   : > { %v2228_v46 = vadd.f32 %v2213_v60, %v2212_v58  ;;  %v2104_v61 = vmax.f32 %v2054_v18, 0.0  ;;  %v2065_v50 = vadd.f32 %v2654_v27, %v1913_v34  ;;  %v2218_v2 = vmul.f32 %v2165_v51, %v2106_v11  ;;  %v2200_v58 = vpop.permute.xlu1 %2199 }
 0x5a3   : > { %v2056_v0 = vpop.f32.mrf.mxu0  ;;  %v2109_v34 = vmax.f32 %v2073_v30, 0.0  ;;  %v2088_v44 = vpop.f32.mrf.mxu1  ;;  %v2112_v24 = vmax.f32 %v2086_v36, 0.0  ;;  %v2114_v23 = vmax.f32 %v2094_v9, 0.0 }
 0x5a4   : > { %v2229_v12 = vadd.f32 %v2228_v46, %v2214_v1  ;;  %v2057_v15 = vadd.f32 %v2056_v0, %v1903_v62  ;;  %v2216_v16 = vmul.f32 %v2155_v54, %v2104_v61  ;;  %v2107_v32 = vmax.f32 %v2065_v50, 0.0  ;;  %v1953_v43 = vpop.permute.xlu0 %1952 }
 0x5a5   : > { %v2110_v54 = vmax.f32 %v2078_v40, 0.0  ;;  %v2221_v41 = vmul.f32 %v2180_v26, %v2109_v34  ;;  %v2089_v21 = vadd.f32 %v2088_v44, %v1943_v19  ;;  %v2097_v38 = vadd.f32 %v2662_v28, %v1953_v43 }
 0x5a6   : > { %v2230_v20 = vadd.f32 %v2229_v12, %v2215_v14  ;;  %v2105_v56 = vmax.f32 %v2057_v15, 0.0  ;;  %v2219_v62 = vmul.f32 %v2170_v52, %v2107_v32  ;;  %v2224_v60 = vmul.f32 %v2195_v22, %v2112_v24  ;;  %v2210_v35 = vpop.permute.xlu1 %2209 }
 0x5a7   : > { %v2222_v42 = vmul.f32 %v2185_v45, %v2110_v54  ;;  %v2113_v52 = vmax.f32 %v2089_v21, 0.0  ;;  %v2115_v59 = vmax.f32 %v2097_v38, 0.0 }
 0x5a8   : > { %v2231_v48 = vadd.f32 %v2230_v20, %v2216_v16  ;;  %v2217_v47 = vmul.f32 %v2160_v63, %v2105_v56  ;;  %v2205_v1 = vpop.permute.xlu0 %2204 }
 0x5a9   : > { %v2225_v18 = vmul.f32 %v2200_v58, %v2113_v52  ;;  %v2226_v26 = vmul.f32 %v2205_v1, %v2114_v23  ;;  %v2227_v45 = vmul.f32 %v2210_v35, %v2115_v59 }
 0x5aa   : > { %v2232_v37 = vadd.f32 %v2231_v48, %v2217_v47  ;;  %v2270_v30 = vpop.permute.xlu1 %2269 }
 0x5ac   : > { %v2233_v57 = vadd.f32 %v2232_v37, %v2218_v2  ;;  %v2265_v19 = vpop.permute.xlu0 %2264 }
 0x5ae   : > { %v2234_v39 = vadd.f32 %v2233_v57, %v2219_v62  ;;  %v2280_v47 = vpop.permute.xlu1 %2279 }
 0x5b0   : > { %v2235_v63 = vadd.f32 %v2234_v39, %v2220_v33  ;;  %v2275_v32 = vpop.permute.xlu0 %2274 }
 0x5b2   : > { %v2236_v51 = vadd.f32 %v2235_v63, %v2221_v41 }
 0x5b4   : > { %v2237_v10 = vadd.f32 %v2236_v51, %v2222_v42 }
 0x5b6   : > { %v2238_v49 = vadd.f32 %v2237_v10, %v2223_v29 }
 0x5b8   : > { %v2239_v27 = vadd.f32 %v2238_v49, %v2224_v60 }
 0x5ba   : > { %v2240_v46 = vadd.f32 %v2239_v27, %v2225_v18 }
 0x5bc   : > { %v2241_v5 = vadd.f32 %v2240_v46, %v2226_v26 }
 0x5be   : > { %v2242_v61 = vadd.f32 %v2241_v5, %v2227_v45 }
 0x5c0   : > { %v2243_v0 = vrot.slane %v2242_v61, 4 }
 0x5c2   : > { %v2244_v14 = vadd.f32 %v2243_v0, %v2242_v61 }
 0x5c4   : > { %v2245_v12 = vrot.slane %v2244_v14, 2 }
 0x5c6   : > { %v2246_v50 = vadd.f32 %v2245_v12, %v2244_v14 }
 0x5c8   : > { %v2247_v15 = vrot.slane %v2246_v50, 1 }
 0x5ca   : > { %v2248_v53 = vadd.f32 %v2247_v15, %v2246_v50 }
 0x5cc   : > { %v2251_v11 = vadd.f32 %v2250_v8, %v2248_v53 }
 0x5ce   : > { %v2433_v16 = vmul.f32 -1.442695, %v2251_v11 }
 0x5d0   : > { %2861 = vpow2.f32 %v2433_v16 }
 0x5dd   : > { %v2862_v20 = vpop.eup %2861 }
 0x5de   : > { %v2255_v56 = vadd.f32 1.0, %v2862_v20 }
 0x5e0   : > { %2863 = vrcp.f32 %v2255_v56 }
 0x5ed   : > { %v2864_v48 = vpop.eup %2863 }
 0x5ee   : > { %v2282_v25 = vadd.f32 %v2864_v48, %v2265_v19  ;;  %v2283_v28 = vadd.f32 %v2864_v48, %v2270_v30  ;;  %v2284_v40 = vadd.f32 %v2864_v48, %v2275_v32  ;;  %v2285_v3 = vadd.f32 %v2864_v48, %v2280_v47 }
 0x5f0   : > { %v2286_v2 = vmul.f32 %v2282_v25, %v3443_v17  ;;  %v2287_v37 = vmul.f32 %v2283_v28, %v3431_v13  ;;  %v2288_v55 = vmul.f32 %v2284_v40, %v3450_v6  ;;  %v2289_v34 = vmul.f32 %v2285_v3, %v3457_v31 }
 0x5f2   : > { %2290 = vst [vmem:[%s3496_s26] sm:$0xff] %v2286_v2  ;;  %2291 = vst [vmem:[%s3496_s26 + $0x8] sm:$0xff] %v2287_v37 }
 0x5f3   : > { %2292 = vst [vmem:[%s3496_s26 + $0x10] sm:$0xff] %v2288_v55  ;;  %2293 = vst [vmem:[%s3496_s26 + $0x18] sm:$0xff] %v2289_v34 }
 0x5f4 PF: > { %s2302_s17 = smul.u32 %s2949_s22, %s2953_s23  ;;  %s2435_s14 = sshll.u32 %s2957_s24, 3 }
 0x5f5   : > { %s2310_s30 = sshll.u32 %s3496_s26, 4  ;;  %s4027_s29 = sand.u32 1, %s2941_s20   ;;  %s3930_s30 = int_to_ptr.vmem [resolvable:$true] %s2310_s30 }
 0x5f6   : > { %s2307_s12 = sadd.s32 %s2435_s14, %s2302_s17  ;;  %s3939_s0 = scalar_lea.sflag [#allocation6], %s4027_s29 }
 0x5f7   : > { %s2436_s19 = sshll.u32 %s2307_s12, 7  ;;  %s2865_s1 = scalar_lea.vmem %s3930_s30, 512 }
 0x5f8   : > { %s3935_s28 = scalar_lea.hbm %s4007_s11, %s2436_s19  ;;  %p2866_p6 = scmp.ne.s32.totalorder %s3930_s30, %s2865_s1 }
 0x5f9   : > { %s2982_s22 = smov [#allocation5]  }
 0x5fa   : > { %p2867_p8 = pnand %p2866_p6, %p3113_p5  ;;  %s2869_s23 = sshll.u32 %s2982_s22, 4  ;;  %s2870_s23 = int_to_ptr.vmem [resolvable:$false] %s2869_s23 }
 0x5fb   : > { %s2871_s24 = scalar_lea.vmem %s2870_s23, 1024  ;;  %p2872_p10 = scmp.lt.s32.totalorder %s3930_s30, %s2870_s23 }
 0x5fc   : > { %p2868_p9 = pneg %p2867_p8  ;;  %p2873_p11 = scmp.lt.s32.totalorder %s2871_s24, %s2865_s1 }
 0x5fe   : > { %p2874_p12 = por %p2873_p11, %p2872_p10 }
 0x600   : > { %p2875_p13 = pnand %p2874_p12, %p2868_p9 }
 0x602   : > { %2878 = shalt.err (!%p2875_p13)
}
 0x603   : > { %s2879_s26 = scalar_lea.hbm %s3935_s28, 512  ;;  %s2883_s12 = scalar_lea.hbm %s4007_s11, 2048 }
 0x604   : > { %p2880_p0 = scmp.ne.s32.totalorder %s3935_s28, %s2879_s26  ;;  %p2884_p3 = scmp.lt.s32.totalorder %s3935_s28, %s4007_s11 }
 0x605   : > { %p2885_p4 = scmp.lt.s32.totalorder %s2883_s12, %s2879_s26 }
 0x606   : > { %p2881_p1 = pnand %p2880_p0, %p3113_p5 }
 0x607   : > { %p2886_p6 = por %p2885_p4, %p2884_p3 }
 0x608   : > { %p2882_p2 = pneg %p2881_p1 }
 0x60a   : > { %p2887_p8 = pnand %p2886_p6, %p2882_p2 }
 0x60c   : > { %2890 = shalt.err (!%p2887_p8)
}
 0x60d   : > { %s2983_s1 = smov 128   ;;  %s2984_s18 = smov 256  }
 0x60e   : > { %s2985_s29 = smov 8  }
 0x60f   : > { %2679 = dma.vmem_to_hbm [thread:$0]  (%p3113_p5), %s3930_s30, 512, %s3935_s28, %s3939_s0, %s2983_s1, %s2984_s18, %s2985_s29  }
 0x610 PF: > { %s4028_s22 = sld [smem:[#allocation8_spill]]  ;;  %p2685_p9 = scmp.ge.s32.totalorder %s2973_s6, 2 }
 0x612   : > { %p2682_p10 = pnand %p2685_p9, %p3122_p7 }
 0x614   : > { %p2683_p11 = pneg %p2682_p10 }
 0x616   : > { %s2325_s24 = sand.u32 1, %s4028_s22  }
 0x617   : > { %s2326_s26 = scalar_lea.sflag [#allocation6], %s2325_s24 }
 0x618   : > { %2932 = dma.done.wait (%p2683_p11), %s2326_s26, 512  }
 0x619   : > { %2934 = vsyncadd (%p2683_p11), %s2326_s26, 4294966784  ;;  %s25_s6 = sadd.s32 1, %s2973_s6   ;;  %s4030_s22 = sld [smem:[#allocation9_spill]] }
 0x61a   : > { %p22_p12 = scmp.ge.s32.totalorder %s25_s6, 10   ;;  %s4031_s23 = sld [smem:[#allocation10_spill]] }
 0x61b   : > { %s4032_s15 = sld [smem:[#allocation11_spill]]  ;;  %s4034_s19 = smov %s2941_s20 }
 0x61c   : > { %s4033_s26 = sld [smem:[#allocation12_spill]]  ;;  %s4035_s20 = smov %s2945_s21 }
 0x61d   : > { %s4036_s21 = smov %s3134_s25  ;;  %s4037_s24 = smov %s2969_s27 }
 0x61e   : > { %s4039_s27 = smov %s4049_s13  ;;  %24 = sbr.rel (!%p22_p12) target bundleno = 10 (0xa), region = 115 }
 0x621   : > { %s4038_s25 = smov %s4032_s15 }
 0x623   :  { %2331 = vsyncpa [#allocation6], 1 }
 0x624   :  { %2333 = vsyncpa [#allocation6 + $0x1], 1 }

</bundles_post_ra>
